<compile_context>
chip_gen: v5e
topology: v5e:2x2
jax: 0.10.0
libtpu: 0.0.40
codegen_flags: <defaults>
</compile_context>

<pallas_src>
import jax
import jax.numpy as jnp
from jax.experimental import pallas as pl
from jax.experimental.pallas import tpu as pltpu

IN_F = 2000     # flattened feature dim (1*1000*2); kept un-padded (full-extent blocks)
HID = 112       # hidden width of encoder.linear1 / decoder.linear2
HID_PAD = 128   # lane-padded hidden dim (zero padding -> exact)


def autoencoder_kernel(x_ref, w1_ref, b1_ref, w234_ref, b234_ref, out_ref):
    # (TB, 2000) activation tile; bf16 operands on the MXU, f32 accumulation.
    # astype is a no-op if the caller already feeds bf16.
    x = x_ref[...].astype(jnp.bfloat16)

    # encoder.linear1 + ReLU
    h = jnp.dot(x, w1_ref[...], preferred_element_type=jnp.float32) + b1_ref[...]
    h = jnp.maximum(h, 0.0)                                   # (TB, 128) f32

    # encoder.linear2 -> decoder.linear1 -> decoder.linear2 folded into one
    # (128, 2000) matmul (exact: no nonlinearity between them), then ReLU.
    y = jnp.dot(h.astype(jnp.bfloat16), w234_ref[...],
                preferred_element_type=jnp.float32) + b234_ref[...]
    out_ref[...] = jnp.maximum(y, 0.0).astype(out_ref.dtype)


def prepare_params(params):
    """Fold, zero-pad and cast the raw (PyTorch-layout) params once."""
    w1, b1, w2, b2, w3, b3, w4, b4 = params

    # Exact algebraic fold of the three activation-free linears (done in f32).
    w234 = (w2 @ w3) @ w4                     # (112, 2000)
    b234 = (b2 @ w3 + b3) @ w4 + b4           # (1, 2000)

    w1p = (jnp.zeros((IN_F, HID_PAD), jnp.float32)
           .at[:, :HID].set(w1)).astype(jnp.bfloat16)          # (2000, 128) bf16
    b1p = jnp.zeros((1, HID_PAD), jnp.float32).at[:, :HID].set(b1)

    w234p = (jnp.zeros((HID_PAD, IN_F), jnp.float32)
             .at[:HID, :].set(w234)).astype(jnp.bfloat16)      # (128, 2000) bf16
    b234p = b234.astype(jnp.float32)                           # (1, 2000) f32

    return (w1p, b1p, w234p, b234p)


def _pick_batch_tile(B, tb):
    """Balanced batch tile: full-dim block for small B, else a multiple of 8.
    Keeps >=2 grid steps once B >= 16 so v7x's two TensorCores both get work."""
    min_steps = 2 if B >= 16 else 1
    n_steps = max(min_steps, -(-B // tb))
    TB = -(-B // n_steps)
    if n_steps > 1:
        TB = ((TB + 7) // 8) * 8      # sublane-divisibility for non-full blocks
    else:
        TB = B                        # full-extent batch block
    grid = (-(-B // TB),)
    return TB, grid


def autoencoder_forward(x_nchw, prepped, *, tb=512, out_dtype=jnp.float32):
    """x_nchw: (B, 1, 1000, 2) (f32 or bf16). Returns (B, 1, 1000, 2) out_dtype."""
    B = x_nchw.shape[0]
    # Contiguous reshape only — no host-side pad / cast / slice HBM passes.
    x_flat = x_nchw.reshape(B, IN_F)

    w1p, b1p, w234p, b234p = prepped
    TB, grid = _pick_batch_tile(B, tb)

    # Weights/biases: full block, constant index map -> fetched once and
    # VMEM-resident across grid steps (~1 MiB total, so the default double
    # buffer on them is negligible vs. the 48 MiB budget).
    resident = lambda a: pl.BlockSpec(a.shape, lambda i: (0, 0))

    out = pl.pallas_call(
        autoencoder_kernel,
        out_shape=jax.ShapeDtypeStruct((B, IN_F), out_dtype),
        grid=grid,
        in_specs=[pl.BlockSpec((TB, IN_F), lambda i: (i, 0)),
                  resident(w1p), resident(b1p),
                  resident(w234p), resident(b234p)],
        out_specs=pl.BlockSpec((TB, IN_F), lambda i: (i, 0)),
        compiler_params=pltpu.CompilerParams(
            dimension_semantics=("parallel",),
            vmem_limit_bytes=48 * 1024 * 1024),
    )(x_flat, w1p, b1p, w234p, b234p)

    return out.reshape(B, 1, 1000, 2)


def init_params(key, latent_dims):
    """Deterministic init matching the nn.Linear shapes (stored as (in, out))."""
    ks = jax.random.split(key, 8)

    def linear(kw, kb, fan_in, fan_out):
        # mimic PyTorch's U(-1/sqrt(fan_in), 1/sqrt(fan_in)) init
        lim = 1.0 / jnp.sqrt(jnp.float32(fan_in))
        w = jax.random.uniform(kw, (fan_in, fan_out), jnp.float32, -lim, lim)
        b = jax.random.uniform(kb, (1, fan_out), jnp.float32, -lim, lim)
        return w, b

    w1, b1 = linear(ks[0], ks[1], 2000, 112)           # encoder.linear1
    w2, b2 = linear(ks[2], ks[3], 112, latent_dims)    # encoder.linear2
    w3, b3 = linear(ks[4], ks[5], latent_dims, 112)    # decoder.linear1
    w4, b4 = linear(ks[6], ks[7], 112, 2000)           # decoder.linear2
    return (w1, b1, w2, b2, w3, b3, w4, b4)


def reference_forward(x_nchw, params):
    """Plain-JAX f32 reference matching the PyTorch module exactly."""
    w1, b1, w2, b2, w3, b3, w4, b4 = params
    x = x_nchw.reshape(x_nchw.shape[0], -1)
    h = jnp.maximum(x @ w1 + b1, 0.0)      # encoder: relu(linear1)
    z = h @ w2 + b2                        # encoder: linear2 (latent)
    d = z @ w3 + b3                        # decoder: linear1 (no activation)
    y = jnp.maximum(d @ w4 + b4, 0.0)      # decoder: relu(linear2)
    return y.reshape(-1, 1, 1000, 2)


if __name__ == "__main__":
    latent_dims = 8
    B = 2

    key = jax.random.PRNGKey(0)
    k_x, k_p = jax.random.split(key)
    # Input flattens to 2000 features per example -> (B, 1, 1000, 2) NCHW.
    x = jax.random.normal(k_x, (B, 1, 1000, 2), dtype=jnp.float32)
    params = init_params(k_p, latent_dims)
    prepped = prepare_params(params)

    fwd = jax.jit(autoencoder_forward, static_argnames=("tb", "out_dtype"))
    out = fwd(x, prepped)
    out = jax.block_until_ready(out)

    ref = reference_forward(x, params)
    assert out.shape == (B, 1, 1000, 2), out.shape
    max_err = float(jnp.max(jnp.abs(out - ref)))
    # bf16 weights/activations on the MXU -> small, expected precision delta.
    assert jnp.allclose(out, ref, atol=5e-2, rtol=5e-2), (
        f"mismatch vs reference: max abs err {max_err}")

    print("KERNEL_OK")
</pallas_src>

<mosaic_0001>
module attributes {stable_mosaic.version = 11 : i64} {
  func.func @autoencoder_kernel(%arg0: i32, %arg1: memref<2x2000xf32, #tpu.memory_space<vmem>>, %arg2: memref<2000x128xbf16, #tpu.memory_space<vmem>>, %arg3: memref<1x128xf32, #tpu.memory_space<vmem>>, %arg4: memref<128x2000xbf16, #tpu.memory_space<vmem>>, %arg5: memref<1x2000xf32, #tpu.memory_space<vmem>>, %arg6: memref<2x2000xf32, #tpu.memory_space<vmem>>) attributes {dimension_semantics = [#tpu.dimension_semantics<parallel>], iteration_bounds = array<i64: 1>, scalar_prefetch = 0 : i64, scratch_operands = 0 : i64, tpu.core_type = #tpu.core_type<tc>, window_params = [{transform_indices = @transform_0, window_bounds = array<i64: 2, 2000>}, {pipeline_mode = #tpu.pipeline_mode<synchronous>, transform_indices = @transform_1, window_bounds = array<i64: 2000, 128>}, {pipeline_mode = #tpu.pipeline_mode<synchronous>, transform_indices = @transform_2, window_bounds = array<i64: 1, 128>}, {pipeline_mode = #tpu.pipeline_mode<synchronous>, transform_indices = @transform_3, window_bounds = array<i64: 128, 2000>}, {pipeline_mode = #tpu.pipeline_mode<synchronous>, transform_indices = @transform_4, window_bounds = array<i64: 1, 2000>}, {transform_indices = @transform_5, window_bounds = array<i64: 2, 2000>}]} {
    %c0 = arith.constant 0 : index
    %c0_0 = arith.constant 0 : index
    %0 = vector.load %arg1[%c0, %c0_0] : memref<2x2000xf32, #tpu.memory_space<vmem>>, vector<2x2000xf32>
    %1 = arith.truncf %0 : vector<2x2000xf32> to vector<2x2000xbf16>
    %c0_1 = arith.constant 0 : index
    %c0_2 = arith.constant 0 : index
    %2 = vector.load %arg2[%c0_1, %c0_2] : memref<2000x128xbf16, #tpu.memory_space<vmem>>, vector<2000x128xbf16>
    %cst = arith.constant dense<0.000000e+00> : vector<2x128xf32>
    %3 = tpu.matmul %1, %2, %cst {dimension_numbers = #tpu.dot_dimension_numbers<[1], [0], [0], [1], [0, 0, 1, 1], [], []>} : vector<2x2000xbf16>, vector<2000x128xbf16>, vector<2x128xf32> -> vector<2x128xf32>
    %c0_3 = arith.constant 0 : index
    %c0_4 = arith.constant 0 : index
    %4 = vector.load %arg3[%c0_3, %c0_4] : memref<1x128xf32, #tpu.memory_space<vmem>>, vector<1x128xf32>
    %5 = vector.broadcast %4 : vector<1x128xf32> to vector<2x128xf32>
    %6 = arith.addf %3, %5 : vector<2x128xf32>
    %cst_5 = arith.constant 0.000000e+00 : f32
    %7 = vector.broadcast %cst_5 : f32 to vector<2x128xf32>
    %8 = arith.maximumf %6, %7 : vector<2x128xf32>
    %9 = arith.truncf %8 : vector<2x128xf32> to vector<2x128xbf16>
    %c0_6 = arith.constant 0 : index
    %c0_7 = arith.constant 0 : index
    %10 = vector.load %arg4[%c0_6, %c0_7] : memref<128x2000xbf16, #tpu.memory_space<vmem>>, vector<128x2000xbf16>
    %cst_8 = arith.constant dense<0.000000e+00> : vector<2x2000xf32>
    %11 = tpu.matmul %9, %10, %cst_8 {dimension_numbers = #tpu.dot_dimension_numbers<[1], [0], [0], [1], [0, 0, 1, 1], [], []>} : vector<2x128xbf16>, vector<128x2000xbf16>, vector<2x2000xf32> -> vector<2x2000xf32>
    %c0_9 = arith.constant 0 : index
    %c0_10 = arith.constant 0 : index
    %12 = vector.load %arg5[%c0_9, %c0_10] : memref<1x2000xf32, #tpu.memory_space<vmem>>, vector<1x2000xf32>
    %13 = vector.broadcast %12 : vector<1x2000xf32> to vector<2x2000xf32>
    %14 = arith.addf %11, %13 : vector<2x2000xf32>
    %cst_11 = arith.constant 0.000000e+00 : f32
    %15 = vector.broadcast %cst_11 : f32 to vector<2x2000xf32>
    %16 = arith.maximumf %14, %15 : vector<2x2000xf32>
    %c0_12 = arith.constant 0 : index
    %c0_13 = arith.constant 0 : index
    %17 = vector.load %arg6[%c0_12, %c0_13] : memref<2x2000xf32, #tpu.memory_space<vmem>>, vector<2x2000xf32>
    tpu.vector_store %arg6[%c0_12, %c0_13], %16 {strides = array<i32>} : memref<2x2000xf32, #tpu.memory_space<vmem>>, vector<2x2000xf32>,
    return
  }
  func.func @transform_0(%arg0: i32) -> (i32, i32) {
    %c0_i32 = arith.constant 0 : i32
    %c0_i32_0 = arith.constant 0 : i32
    return %arg0, %c0_i32 : i32, i32
  }
  func.func @transform_1(%arg0: i32) -> (i32, i32) {
    %c0_i32 = arith.constant 0 : i32
    %c0_i32_0 = arith.constant 0 : i32
    %c0_i32_1 = arith.constant 0 : i32
    return %c0_i32, %c0_i32_0 : i32, i32
  }
  func.func @transform_2(%arg0: i32) -> (i32, i32) {
    %c0_i32 = arith.constant 0 : i32
    %c0_i32_0 = arith.constant 0 : i32
    %c0_i32_1 = arith.constant 0 : i32
    return %c0_i32, %c0_i32_0 : i32, i32
  }
  func.func @transform_3(%arg0: i32) -> (i32, i32) {
    %c0_i32 = arith.constant 0 : i32
    %c0_i32_0 = arith.constant 0 : i32
    %c0_i32_1 = arith.constant 0 : i32
    return %c0_i32, %c0_i32_0 : i32, i32
  }
  func.func @transform_4(%arg0: i32) -> (i32, i32) {
    %c0_i32 = arith.constant 0 : i32
    %c0_i32_0 = arith.constant 0 : i32
    %c0_i32_1 = arith.constant 0 : i32
    return %c0_i32, %c0_i32_0 : i32, i32
  }
  func.func @transform_5(%arg0: i32) -> (i32, i32) {
    %c0_i32 = arith.constant 0 : i32
    %c0_i32_0 = arith.constant 0 : i32
    return %arg0, %c0_i32 : i32, i32
  }
}

</mosaic_0001>

<bundles_post_ra>
// kernel: autoencoder_forward.1
= control target key start
LH: loop header
LB: loop body
LE: loop exit
PB: predicated region body
PF: predicated region fallthrough
CT: control target
= control target key end

     0   :  { %vm1086_vm0 = vcmask 654336   ;;  %vm2356_vm1 = vcmask 1041408   ;;  %vm2358_vm2 = vcmask 1045508   ;;  %vm2360_vm3 = vcmask 1043456   ;;  %s4926_s1 = inlined_call_operand.vmem [shape: bf16[2000,128], index: 1, kind: input, shape index: {}]   ;;  %s4927_s0 = inlined_call_operand.vmem [shape: f32[2,2000], index: 0, kind: input, shape index: {}]   ;;  %s4928_s2 = inlined_call_operand.vmem [shape: f32[1,128], index: 2, kind: input, shape index: {}]   ;;  %s4929_s3 = inlined_call_operand.vmem [shape: bf16[128,2000], index: 3, kind: input, shape index: {}]   ;;  %s4930_s4 = inlined_call_operand.vmem [shape: f32[1,2000], index: 4, kind: input, shape index: {}]   ;;  %s4931_s5 = inlined_call_operand.vmem [shape: f32[2,2000], index: 5, kind: output, shape index: {}]  }
   0x1   :  { %v3408_v0 = vld [vmem:[%s4926_s1 + $0x38] sm:$0xff]  ;;  %v3407_v4 = vld [vmem:[%s4926_s1 + $0x30] sm:$0xff]  ;;  %v3406_v8 = vld [vmem:[%s4926_s1 + $0x28] sm:$0xff]  ;;  %vm2378_vm4 = vcmask 1043458   ;;  %vm2381_vm7 = vcmask 654342  }
   0x2   :  { %v3416_v1 = vld [vmem:[%s4926_s1 + $0x78] sm:$0xff]  ;;  %1090 = vmatpush.bf16.msra.mxu0 %v3408_v0  ;;  %v3415_v5 = vld [vmem:[%s4926_s1 + $0x70] sm:$0xff]  ;;  %v3414_v9 = vld [vmem:[%s4926_s1 + $0x68] sm:$0xff] }
   0x3   :  { %v3424_v2 = vld [vmem:[%s4926_s1 + $0xb8] sm:$0xff]  ;;  %1103 = vmatpush.bf16.msra.mxu1 %v3416_v1  ;;  %v3423_v6 = vld [vmem:[%s4926_s1 + $0xb0] sm:$0xff]  ;;  %v3422_v10 = vld [vmem:[%s4926_s1 + $0xa8] sm:$0xff] }
   0x4   :  { %v3432_v3 = vld [vmem:[%s4926_s1 + $0xf8] sm:$0xff]  ;;  %1116 = vmatpush.bf16.msra.mxu2 %v3424_v2  ;;  %v3431_v7 = vld [vmem:[%s4926_s1 + $0xf0] sm:$0xff]  ;;  %v3430_v11 = vld [vmem:[%s4926_s1 + $0xe8] sm:$0xff] }
   0x5   :  { %1129 = vmatpush.bf16.msra.mxu3 %v3432_v3  ;;  %v3405_v12 = vld [vmem:[%s4926_s1 + $0x20] sm:$0xff]  ;;  %v3404_v16 = vld [vmem:[%s4926_s1 + $0x18] sm:$0xff]  ;;  %v3403_v21 = vld [vmem:[%s4926_s1 + $0x10] sm:$0xff] }
   0x6   :  { %1091 = vmatpush.bf16.msra.mxu0 %v3407_v4  ;;  %v3413_v13 = vld [vmem:[%s4926_s1 + $0x60] sm:$0xff]  ;;  %v3412_v17 = vld [vmem:[%s4926_s1 + $0x58] sm:$0xff]  ;;  %v3411_v22 = vld [vmem:[%s4926_s1 + $0x50] sm:$0xff] }
   0x7   :  { %1104 = vmatpush.bf16.msra.mxu1 %v3415_v5  ;;  %v3421_v14 = vld [vmem:[%s4926_s1 + $0xa0] sm:$0xff]  ;;  %v3420_v18 = vld [vmem:[%s4926_s1 + $0x98] sm:$0xff]  ;;  %v3419_v23 = vld [vmem:[%s4926_s1 + $0x90] sm:$0xff] }
   0x8   :  { %1117 = vmatpush.bf16.msra.mxu2 %v3423_v6  ;;  %v3429_v15 = vld [vmem:[%s4926_s1 + $0xe0] sm:$0xff]  ;;  %v3428_v19 = vld [vmem:[%s4926_s1 + $0xd8] sm:$0xff]  ;;  %v3427_v24 = vld [vmem:[%s4926_s1 + $0xd0] sm:$0xff] }
   0x9   :  { %1130 = vmatpush.bf16.msra.mxu3 %v3431_v7  ;;  %v21_v20 = vld [vmem:[%s4927_s0] sm:$0xff]  ;;  %v3402_v25 = vld [vmem:[%s4926_s1 + $0x8] sm:$0xff]  ;;  %v23_v31 = vld [vmem:[%s4927_s0 + $0x10] sm:$0xff] }
   0xa   :  { %1092 = vmatpush.bf16.msra.mxu0 %v3406_v8  ;;  %29 = vst [vmem:[#allocation1] ss:$4 sm:$0xff] %v21_v20  ;;  %v3410_v26 = vld [vmem:[%s4926_s1 + $0x48] sm:$0xff]  ;;  %v3401_v29 = vld [vmem:[%s4926_s1] sm:$0xff]  ;;  %v3440_v37 = vld [vmem:[%s4926_s1 + $0x138] sm:$0xff] }
   0xb   :  { %1105 = vmatpush.bf16.msra.mxu1 %v3414_v9  ;;  %v3418_v27 = vld [vmem:[%s4926_s1 + $0x88] sm:$0xff]  ;;  %v3409_v30 = vld [vmem:[%s4926_s1 + $0x40] sm:$0xff]  ;;  %v3448_v38 = vld [vmem:[%s4926_s1 + $0x178] sm:$0xff] }
   0xc   :  { %1118 = vmatpush.bf16.msra.mxu2 %v3422_v10  ;;  %v3426_v28 = vld [vmem:[%s4926_s1 + $0xc8] sm:$0xff]  ;;  %v3417_v36 = vld [vmem:[%s4926_s1 + $0x80] sm:$0xff]  ;;  %v3456_v39 = vld [vmem:[%s4926_s1 + $0x1b8] sm:$0xff] }
   0xd   :  { %1131 = vmatpush.bf16.msra.mxu3 %v3430_v11  ;;  %v3425_v40 = vld [vmem:[%s4926_s1 + $0xc0] sm:$0xff]  ;;  %v22_v42 = vld [vmem:[%s4927_s0 + $0x8] sm:$0xff]  ;;  %v3464_v43 = vld [vmem:[%s4926_s1 + $0x1f8] sm:$0xff] }
   0xe   :  { %1093 = vmatpush.bf16.msra.mxu0 %v3405_v12  ;;  %31 = vst [vmem:[#allocation1 + $0x20] ss:$4 sm:$0xff] %v22_v42  ;;  %v3439_v45 = vld [vmem:[%s4926_s1 + $0x130] sm:$0xff]  ;;  %v3438_v51 = vld [vmem:[%s4926_s1 + $0x128] sm:$0xff]  ;;  %v3437_v58 = vld [vmem:[%s4926_s1 + $0x120] sm:$0xff] }
   0xf   :  { %1106 = vmatpush.bf16.msra.mxu1 %v3413_v13  ;;  %v3447_v47 = vld [vmem:[%s4926_s1 + $0x170] sm:$0xff]  ;;  %v3446_v52 = vld [vmem:[%s4926_s1 + $0x168] sm:$0xff]  ;;  %v24_v59 = vld [vmem:[%s4927_s0 + $0x18] sm:$0xff] }
  0x10   :  { %1119 = vmatpush.bf16.msra.mxu2 %v3421_v14  ;;  %v3455_v48 = vld [vmem:[%s4926_s1 + $0x1b0] sm:$0xff]  ;;  %v3454_v53 = vld [vmem:[%s4926_s1 + $0x1a8] sm:$0xff]  ;;  %v3445_v61 = vld [vmem:[%s4926_s1 + $0x160] sm:$0xff] }
  0x11   :  { %1132 = vmatpush.bf16.msra.mxu3 %v3429_v15  ;;  %v34_v32 = vld.sshfl [vmem:[#allocation1 + $0x10] sm:$0xff pattern:$0x73625140]  ;;  %v32_v33 = vld.sshfl [vmem:[#allocation1] sm:$0xff pattern:$0x73625140]  ;;  %vm2379_vm5 = vmor %vm2378_vm4, %vm2356_vm1 }
  0x12   :  { %1094 = vmatpush.bf16.msra.mxu0 %v3404_v16  ;;  %v35_v34 = vld.sshfl [vmem:[#allocation1 + $0x18] sm:$0xff pattern:$0x73625140]  ;;  %v33_v35 = vld.sshfl [vmem:[#allocation1 + $0x8] sm:$0xff pattern:$0x73625140]  ;;  %v66_v41 = vpack.c.bf16 %v32_v33, %v32_v33  ;;  %v68_v44 = vpack.c.bf16 %v34_v32, %v34_v32  ;;  %vm2380_vm6 = vmor %vm2358_vm2, %vm2379_vm5 }
  0x13   :  { %1107 = vmatpush.bf16.msra.mxu1 %v3412_v17  ;;  %40 = vst [vmem:[#allocation1] ss:$4 sm:$0xff] %v23_v31  ;;  %v67_v46 = vpack.c.bf16 %v33_v35, %v33_v35  ;;  %v69_v49 = vpack.c.bf16 %v35_v34, %v35_v34  ;;  %v3463_v50 = vld [vmem:[%s4926_s1 + $0x1f0] sm:$0xff]  ;;  %v3462_v54 = vld [vmem:[%s4926_s1 + $0x1e8] sm:$0xff]  ;;  %v3453_v62 = vld [vmem:[%s4926_s1 + $0x1a0] sm:$0xff] }
  0x14   :  { %1120 = vmatpush.bf16.msra.mxu2 %v3420_v18  ;;  %v3461_v63 = vld [vmem:[%s4926_s1 + $0x1e0] sm:$0xff]  ;;  %v3436_v0 = vld [vmem:[%s4926_s1 + $0x118] sm:$0xff]  ;;  %v3435_v4 = vld [vmem:[%s4926_s1 + $0x110] sm:$0xff] }
  0x15   :  { %1133 = vmatpush.bf16.msra.mxu3 %v3428_v19  ;;  %v3826_v55 = vld.sshfl [vmem:[#allocation1 + $0x30] sm:$0xff pattern:$0x73625140]  ;;  %v3828_v56 = vld.sshfl [vmem:[#allocation1 + $0x20] sm:$0xff pattern:$0x73625140]  ;;  %vm2382_vm8 = vmor %vm2381_vm7, %vm2380_vm6 }
  0x16   :  { %1095 = vmatpush.bf16.msra.mxu0 %v3403_v21  ;;  %v3830_v57 = vld.sshfl [vmem:[#allocation1 + $0x38] sm:$0xff pattern:$0x73625140]  ;;  %v37_v60 = vld.sshfl [vmem:[#allocation1 + $0x28] sm:$0xff pattern:$0x73625140]  ;;  %v72_v20 = vpack.c.bf16 %v3826_v55, %v3826_v55  ;;  %v70_v21 = vpack.c.bf16 %v3828_v56, %v3828_v56 }
  0x17   :  { %1108 = vmatpush.bf16.msra.mxu1 %v3411_v22  ;;  %41 = vst [vmem:[#allocation1 + $0x20] ss:$4 sm:$0xff] %v24_v59  ;;  %v3444_v1 = vld [vmem:[%s4926_s1 + $0x158] sm:$0xff]  ;;  %v3443_v5 = vld [vmem:[%s4926_s1 + $0x150] sm:$0xff]  ;;  %v3434_v8 = vld [vmem:[%s4926_s1 + $0x108] sm:$0xff]  ;;  %v71_v22 = vpack.c.bf16 %v37_v60, %v37_v60 }
  0x18   :  { %1121 = vmatpush.bf16.msra.mxu2 %v3419_v23  ;;  %v3452_v2 = vld [vmem:[%s4926_s1 + $0x198] sm:$0xff]  ;;  %v3451_v6 = vld [vmem:[%s4926_s1 + $0x190] sm:$0xff]  ;;  %v3442_v9 = vld [vmem:[%s4926_s1 + $0x148] sm:$0xff] }
  0x19   :  { %1134 = vmatpush.bf16.msra.mxu3 %v3427_v24  ;;  %v3460_v3 = vld [vmem:[%s4926_s1 + $0x1d8] sm:$0xff]  ;;  %v3459_v7 = vld [vmem:[%s4926_s1 + $0x1d0] sm:$0xff]  ;;  %v3450_v10 = vld [vmem:[%s4926_s1 + $0x188] sm:$0xff] }
  0x1a   :  { %1096 = vmatpush.bf16.msra.mxu0 %v3402_v25  ;;  %v3458_v11 = vld [vmem:[%s4926_s1 + $0x1c8] sm:$0xff]  ;;  %v3433_v12 = vld [vmem:[%s4926_s1 + $0x100] sm:$0xff]  ;;  %v3472_v15 = vld [vmem:[%s4926_s1 + $0x238] sm:$0xff] }
  0x1b   :  { %1109 = vmatpush.bf16.msra.mxu1 %v3410_v26  ;;  %v3441_v13 = vld [vmem:[%s4926_s1 + $0x140] sm:$0xff]  ;;  %v3480_v16 = vld [vmem:[%s4926_s1 + $0x278] sm:$0xff]  ;;  %v3471_v23 = vld [vmem:[%s4926_s1 + $0x230] sm:$0xff]  ;;  %v73_v26 = vpack.c.bf16 %v3830_v57, %v3830_v57 }
  0x1c   :  { %1122 = vmatpush.bf16.msra.mxu2 %v3418_v27  ;;  %v3449_v14 = vld [vmem:[%s4926_s1 + $0x180] sm:$0xff]  ;;  %v3488_v17 = vld [vmem:[%s4926_s1 + $0x2b8] sm:$0xff]  ;;  %v3479_v24 = vld [vmem:[%s4926_s1 + $0x270] sm:$0xff] }
  0x1d   :  { %1135 = vmatpush.bf16.msra.mxu3 %v3426_v28  ;;  %v3457_v18 = vld [vmem:[%s4926_s1 + $0x1c0] sm:$0xff]  ;;  %v3496_v19 = vld [vmem:[%s4926_s1 + $0x2f8] sm:$0xff]  ;;  %v3487_v25 = vld [vmem:[%s4926_s1 + $0x2b0] sm:$0xff] }
  0x1e   :  { %1097 = vmatpush.bf16.msra.mxu0 %v3401_v29  ;;  %v3495_v27 = vld [vmem:[%s4926_s1 + $0x2f0] sm:$0xff]  ;;  %v3470_v28 = vld [vmem:[%s4926_s1 + $0x228] sm:$0xff]  ;;  %v3469_v32 = vld [vmem:[%s4926_s1 + $0x220] sm:$0xff] }
  0x1f   :  { %1110 = vmatpush.bf16.msra.mxu1 %v3409_v30  ;;  %v3478_v29 = vld [vmem:[%s4926_s1 + $0x268] sm:$0xff]  ;;  %v3477_v33 = vld [vmem:[%s4926_s1 + $0x260] sm:$0xff]  ;;  %v3483_v42 = vld [vmem:[%s4926_s1 + $0x290] sm:$0xff] }
  0x20   :  { %1123 = vmatpush.bf16.msra.mxu2 %v3417_v36  ;;  %v3486_v30 = vld [vmem:[%s4926_s1 + $0x2a8] sm:$0xff]  ;;  %v3485_v34 = vld [vmem:[%s4926_s1 + $0x2a0] sm:$0xff]  ;;  %v3468_v36 = vld [vmem:[%s4926_s1 + $0x218] sm:$0xff] }
  0x21   :  { %1136 = vmatpush.bf16.msra.mxu3 %v3425_v40  ;;  %1098 = vmatmul.bf16.vlgmr.msra.gmra.mxu0 %v66_v41  ;;  %v3494_v31 = vld [vmem:[%s4926_s1 + $0x2e8] sm:$0xff]  ;;  %v3493_v35 = vld [vmem:[%s4926_s1 + $0x2e0] sm:$0xff]  ;;  %v3467_v40 = vld [vmem:[%s4926_s1 + $0x210] sm:$0xff] }
  0x22   :  { %1142 = vmatpush.bf16.msrb.mxu0 %v3440_v37  ;;  %1111 = vmatmul.bf16.vlgmr.msra.gmra.mxu1 %v67_v46  ;;  %v3476_v37 = vld [vmem:[%s4926_s1 + $0x258] sm:$0xff]  ;;  %v3475_v41 = vld [vmem:[%s4926_s1 + $0x250] sm:$0xff]  ;;  %v3482_v46 = vld [vmem:[%s4926_s1 + $0x288] sm:$0xff] }
  0x23   :  { %1155 = vmatpush.bf16.msrb.mxu1 %v3448_v38  ;;  %1124 = vmatmul.bf16.vlgmr.msra.gmra.mxu2 %v68_v44  ;;  %v3484_v38 = vld [vmem:[%s4926_s1 + $0x298] sm:$0xff]  ;;  %v3466_v44 = vld [vmem:[%s4926_s1 + $0x208] sm:$0xff]  ;;  %v3489_v57 = vld [vmem:[%s4926_s1 + $0x2c0] sm:$0xff] }
  0x24   :  { %1168 = vmatpush.bf16.msrb.mxu2 %v3456_v39  ;;  %1137 = vmatmul.bf16.vlgmr.msra.gmra.mxu3 %v69_v49  ;;  %v3492_v39 = vld [vmem:[%s4926_s1 + $0x2d8] sm:$0xff]  ;;  %v3473_v49 = vld [vmem:[%s4926_s1 + $0x240] sm:$0xff] }
  0x25   :  { %1181 = vmatpush.bf16.msrb.mxu3 %v3464_v43  ;;  %v3491_v43 = vld [vmem:[%s4926_s1 + $0x2d0] sm:$0xff]  ;;  %v3512_v55 = vld [vmem:[%s4926_s1 + $0x378] sm:$0xff] }
  0x26   :  { %1143 = vmatpush.bf16.msrb.mxu0 %v3439_v45  ;;  %v3474_v45 = vld [vmem:[%s4926_s1 + $0x248] sm:$0xff]  ;;  %v3520_v56 = vld [vmem:[%s4926_s1 + $0x3b8] sm:$0xff] }
  0x27   :  { %1156 = vmatpush.bf16.msrb.mxu1 %v3447_v47  ;;  %v3490_v47 = vld [vmem:[%s4926_s1 + $0x2c8] sm:$0xff]  ;;  %v45_v59 = vld.sshfl [vmem:[#allocation1 + $0x18] sm:$0xff pattern:$0x73625140] }
  0x28   :  { %1169 = vmatpush.bf16.msrb.mxu2 %v3455_v48  ;;  %v3465_v48 = vld [vmem:[%s4926_s1 + $0x200] sm:$0xff] }
  0x29   :  { %1182 = vmatpush.bf16.msrb.mxu3 %v3463_v50  ;;  %v3481_v50 = vld [vmem:[%s4926_s1 + $0x280] sm:$0xff] }
  0x2a   :  { %1144 = vmatpush.bf16.msrb.mxu0 %v3438_v51  ;;  %v3504_v51 = vld [vmem:[%s4926_s1 + $0x338] sm:$0xff] }
  0x2b   :  { %1157 = vmatpush.bf16.msrb.mxu1 %v3446_v52  ;;  %v42_v52 = vld.sshfl [vmem:[#allocation1] sm:$0xff pattern:$0x73625140] }
  0x2c   :  { %1170 = vmatpush.bf16.msrb.mxu2 %v3454_v53  ;;  %v44_v53 = vld.sshfl [vmem:[#allocation1 + $0x10] sm:$0xff pattern:$0x73625140] }
  0x2d   :  { %1183 = vmatpush.bf16.msrb.mxu3 %v3462_v54  ;;  %v43_v54 = vld.sshfl [vmem:[#allocation1 + $0x8] sm:$0xff pattern:$0x73625140]  ;;  %v76_v60 = vpack.c.bf16 %v44_v53, %v44_v53 }
  0x2e   :  { %1145 = vmatpush.bf16.msrb.mxu0 %v3437_v58  ;;  %v74_v58 = vpack.c.bf16 %v42_v52, %v42_v52  ;;  %v3639_v52 = vld [vmem:[%s4929_s3 + $0x38c] sm:$0xf] }
  0x2f   :  { %1158 = vmatpush.bf16.msrb.mxu1 %v3445_v61  ;;  %v75_v61 = vpack.c.bf16 %v43_v54, %v43_v54  ;;  %v3349_v53 = vld [vmem:[%s4929_s3 + $0x3c8] sm:$0xf0]  ;;  %v3275_v54 = vld [vmem:[%s4929_s3 + $0x300] sm:$0xf] }
  0x30   :  { %1171 = vmatpush.bf16.msrb.mxu2 %v3453_v62  ;;  %v3503_v62 = vld [vmem:[%s4926_s1 + $0x330] sm:$0xff] }
  0x31   :  { %1184 = vmatpush.bf16.msrb.mxu3 %v3461_v63  ;;  %v3525_v63 = vld [vmem:[%s4926_s1 + $0x3e0] sm:$0xff] }
  0x32   :  { %1146 = vmatpush.bf16.msrb.mxu0 %v3436_v0  ;;  %v77_v0 = vpack.c.bf16 %v45_v59, %v45_v59  ;;  %v3277_v59 = vld [vmem:[%s4929_s3 + $0x340] sm:$0xf0] }
  0x33   :  { %1159 = vmatpush.bf16.msrb.mxu1 %v3444_v1  ;;  %v3511_v1 = vld [vmem:[%s4926_s1 + $0x370] sm:$0xff] }
  0x34   :  { %1172 = vmatpush.bf16.msrb.mxu2 %v3452_v2  ;;  %v3519_v2 = vld [vmem:[%s4926_s1 + $0x3b0] sm:$0xff] }
  0x35   :  { %1185 = vmatpush.bf16.msrb.mxu3 %v3460_v3  ;;  %v3502_v3 = vld [vmem:[%s4926_s1 + $0x328] sm:$0xff] }
  0x36   :  { %1147 = vmatpush.bf16.msrb.mxu0 %v3435_v4  ;;  %v3524_v4 = vld [vmem:[%s4926_s1 + $0x3d8] sm:$0xff] }
  0x37   :  { %1160 = vmatpush.bf16.msrb.mxu1 %v3443_v5  ;;  %v3510_v5 = vld [vmem:[%s4926_s1 + $0x368] sm:$0xff] }
  0x38   :  { %1173 = vmatpush.bf16.msrb.mxu2 %v3451_v6  ;;  %v3518_v6 = vld [vmem:[%s4926_s1 + $0x3a8] sm:$0xff] }
  0x39   :  { %1186 = vmatpush.bf16.msrb.mxu3 %v3459_v7  ;;  %v3501_v7 = vld [vmem:[%s4926_s1 + $0x320] sm:$0xff] }
  0x3a   :  { %1148 = vmatpush.bf16.msrb.mxu0 %v3434_v8  ;;  %v3523_v8 = vld [vmem:[%s4926_s1 + $0x3d0] sm:$0xff] }
  0x3b   :  { %1161 = vmatpush.bf16.msrb.mxu1 %v3442_v9  ;;  %v3509_v9 = vld [vmem:[%s4926_s1 + $0x360] sm:$0xff] }
  0x3c   :  { %1174 = vmatpush.bf16.msrb.mxu2 %v3450_v10  ;;  %v3517_v10 = vld [vmem:[%s4926_s1 + $0x3a0] sm:$0xff] }
  0x3d   :  { %1187 = vmatpush.bf16.msrb.mxu3 %v3458_v11  ;;  %v3500_v11 = vld [vmem:[%s4926_s1 + $0x318] sm:$0xff] }
  0x3e   :  { %1149 = vmatpush.bf16.msrb.mxu0 %v3433_v12  ;;  %v3522_v12 = vld [vmem:[%s4926_s1 + $0x3c8] sm:$0xff] }
  0x3f   :  { %1162 = vmatpush.bf16.msrb.mxu1 %v3441_v13  ;;  %v3508_v13 = vld [vmem:[%s4926_s1 + $0x358] sm:$0xff] }
  0x40   :  { %1175 = vmatpush.bf16.msrb.mxu2 %v3449_v14  ;;  %v3516_v14 = vld [vmem:[%s4926_s1 + $0x398] sm:$0xff] }
  0x41   :  { %1188 = vmatpush.bf16.msrb.mxu3 %v3457_v18  ;;  %1150 = vmatmul.bf16.vlgmr.msrb.gmra.mxu0 %v70_v21  ;;  %v3507_v18 = vld [vmem:[%s4926_s1 + $0x350] sm:$0xff]  ;;  %v3498_v21 = vld [vmem:[%s4926_s1 + $0x308] sm:$0xff] }
  0x42   :  { %1194 = vmatpush.bf16.msra.mxu0 %v3472_v15  ;;  %1163 = vmatmul.bf16.vlgmr.msrb.gmra.mxu1 %v71_v22  ;;  %v3499_v15 = vld [vmem:[%s4926_s1 + $0x310] sm:$0xff]  ;;  %v3506_v22 = vld [vmem:[%s4926_s1 + $0x348] sm:$0xff] }
  0x43   :  { %1207 = vmatpush.bf16.msra.mxu1 %v3480_v16  ;;  %1176 = vmatmul.bf16.vlgmr.msrb.gmra.mxu2 %v72_v20  ;;  %v3521_v16 = vld [vmem:[%s4926_s1 + $0x3c0] sm:$0xff] }
  0x44   :  { %1220 = vmatpush.bf16.msra.mxu2 %v3488_v17  ;;  %1189 = vmatmul.bf16.vlgmr.msrb.gmra.mxu3 %v73_v26  ;;  %v49_v17 = vld.sshfl [vmem:[#allocation1 + $0x38] sm:$0xff pattern:$0x73625140]  ;;  %v3505_v26 = vld [vmem:[%s4926_s1 + $0x340] sm:$0xff] }
  0x45   :  { %1233 = vmatpush.bf16.msra.mxu3 %v3496_v19  ;;  %v3515_v19 = vld [vmem:[%s4926_s1 + $0x390] sm:$0xff]  ;;  %v81_v20 = vpack.c.bf16 %v49_v17, %v49_v17  ;;  %v3598_v17 = vld [vmem:[%s4929_s3 + $0x23c] sm:$0xf0] }
  0x46   :  { %1195 = vmatpush.bf16.msra.mxu0 %v3471_v23  ;;  %v3514_v23 = vld [vmem:[%s4926_s1 + $0x388] sm:$0xff] }
  0x47   :  { %1208 = vmatpush.bf16.msra.mxu1 %v3479_v24  ;;  %v3497_v24 = vld [vmem:[%s4926_s1 + $0x300] sm:$0xff] }
  0x48   :  { %1221 = vmatpush.bf16.msra.mxu2 %v3487_v25  ;;  %v46_v25 = vld.sshfl [vmem:[#allocation1 + $0x20] sm:$0xff pattern:$0x73625140] }
  0x49   :  { %1234 = vmatpush.bf16.msra.mxu3 %v3495_v27  ;;  %v47_v27 = vld.sshfl [vmem:[#allocation1 + $0x28] sm:$0xff pattern:$0x73625140] }
  0x4a   :  { %1196 = vmatpush.bf16.msra.mxu0 %v3470_v28  ;;  %v3513_v28 = vld [vmem:[%s4926_s1 + $0x380] sm:$0xff] }
  0x4b   :  { %1209 = vmatpush.bf16.msra.mxu1 %v3478_v29  ;;  %v48_v29 = vld.sshfl [vmem:[#allocation1 + $0x30] sm:$0xff pattern:$0x73625140] }
  0x4c   :  { %1222 = vmatpush.bf16.msra.mxu2 %v3486_v30  ;;  %v78_v30 = vpack.c.bf16 %v46_v25, %v46_v25  ;;  %v3157_v25 = vld [vmem:[%s4929_s3 + $0x248] sm:$0xf0] }
  0x4d   :  { %1235 = vmatpush.bf16.msra.mxu3 %v3494_v31  ;;  %v79_v31 = vpack.c.bf16 %v47_v27, %v47_v27 }
  0x4e   :  { %1197 = vmatpush.bf16.msra.mxu0 %v3469_v32  ;;  %v80_v32 = vpack.c.bf16 %v48_v29, %v48_v29 }
  0x4f   :  { %1210 = vmatpush.bf16.msra.mxu1 %v3477_v33  ;;  %v3654_v33 = vld [vmem:[%s4928_s2] ss:$0 sm:$0xff] }
  0x50   :  { %1223 = vmatpush.bf16.msra.mxu2 %v3485_v34 }
  0x51   :  { %1236 = vmatpush.bf16.msra.mxu3 %v3493_v35 }
  0x52   :  { %1198 = vmatpush.bf16.msra.mxu0 %v3468_v36 }
  0x53   :  { %1211 = vmatpush.bf16.msra.mxu1 %v3476_v37 }
  0x54   :  { %1224 = vmatpush.bf16.msra.mxu2 %v3484_v38 }
  0x55   :  { %1237 = vmatpush.bf16.msra.mxu3 %v3492_v39 }
  0x56   :  { %1199 = vmatpush.bf16.msra.mxu0 %v3467_v40 }
  0x57   :  { %1212 = vmatpush.bf16.msra.mxu1 %v3475_v41  ;;  %v3339_v41 = vld [vmem:[%s4929_s3 + $0x380] sm:$0xf] }
  0x58   :  { %1225 = vmatpush.bf16.msra.mxu2 %v3483_v42  ;;  %v3646_v42 = vld [vmem:[%s4929_s3 + $0x3bc] sm:$0xf0] }
  0x59   :  { %1238 = vmatpush.bf16.msra.mxu3 %v3491_v43  ;;  %v3638_v43 = vld [vmem:[%s4929_s3 + $0x384] sm:$0xf] }
  0x5a   :  { %1200 = vmatpush.bf16.msra.mxu0 %v3466_v44  ;;  %v3340_v44 = vor.u32 %v3646_v42, %v3339_v41 }
  0x5b   :  { %1213 = vmatpush.bf16.msra.mxu1 %v3474_v45  ;;  %v3341_v45 = vld [vmem:[%s4929_s3 + $0x3c0] sm:$0xf0] }
  0x5c   :  { %1226 = vmatpush.bf16.msra.mxu2 %v3482_v46  ;;  %v3347_v46 = vld [vmem:[%s4929_s3 + $0x388] sm:$0xf] }
  0x5d   :  { %1239 = vmatpush.bf16.msra.mxu3 %v3490_v47  ;;  %v3647_v47 = vld [vmem:[%s4929_s3 + $0x3c4] sm:$0xf0] }
  0x5e   :  { %1201 = vmatpush.bf16.msra.mxu0 %v3465_v48 }
  0x5f   :  { %1214 = vmatpush.bf16.msra.mxu1 %v3473_v49 }
  0x60   :  { %1227 = vmatpush.bf16.msra.mxu2 %v3481_v50  ;;  %v3344_v50 = vor.u32 %v3638_v43, %v3341_v45  ;;  %v3566_v45 = vld [vmem:[%s4929_s3 + $0x13c] sm:$0xf0] }
  0x61   :  { %1240 = vmatpush.bf16.msra.mxu3 %v3489_v57  ;;  %1202 = vmatmul.bf16.vlgmr.msra.gmra.mxu0 %v74_v58  ;;  %v3630_v57 = vld [vmem:[%s4929_s3 + $0x33c] sm:$0xf0]  ;;  %v3622_v58 = vld [vmem:[%s4929_s3 + $0x304] sm:$0xf] }
  0x62   :  { %1246 = vmatpush.bf16.msrb.mxu0 %v3504_v51  ;;  %1215 = vmatmul.bf16.vlgmr.msra.gmra.mxu1 %v75_v61  ;;  %v3348_v51 = vor.u32 %v3647_v47, %v3347_v46  ;;  %v3280_v61 = vor.u32 %v3622_v58, %v3277_v59  ;;  %v3558_v46 = vld [vmem:[%s4929_s3 + $0x104] sm:$0xf]  ;;  %v2955_v58 = vld [vmem:[%s4929_s3 + $0x80] sm:$0xf] }
  0x63   :  { %1259 = vmatpush.bf16.msrb.mxu1 %v3512_v55  ;;  %1228 = vmatmul.bf16.vlgmr.msra.gmra.mxu2 %v76_v60  ;;  %v3276_v60 = vor.u32 %v3630_v57, %v3275_v54  ;;  %v3029_v54 = vld [vmem:[%s4929_s3 + $0x148] sm:$0xf0]  ;;  %v3550_v59 = vld [vmem:[%s4929_s3 + $0xbc] sm:$0xf0] }
  0x64   :  { %1272 = vmatpush.bf16.msrb.mxu2 %v3520_v56  ;;  %1241 = vmatmul.bf16.vlgmr.msra.gmra.mxu3 %v77_v0  ;;  %v3352_v56 = vor.u32 %v3639_v52, %v3349_v53  ;;  %v3623_v0 = vld [vmem:[%s4929_s3 + $0x30c] sm:$0xf] }
  0x65   :  { %1288 = vmatpush.bf16.msrb.mxu3 %v3525_v63  ;;  %v3631_v63 = vld [vmem:[%s4929_s3 + $0x344] sm:$0xf0]  ;;  %v3559_v53 = vld [vmem:[%s4929_s3 + $0x10c] sm:$0xf] }
  0x66   :  { %1247 = vmatpush.bf16.msrb.mxu0 %v3503_v62  ;;  %v3283_v62 = vld [vmem:[%s4929_s3 + $0x308] sm:$0xf] }
  0x67   :  { %1260 = vmatpush.bf16.msrb.mxu1 %v3511_v1  ;;  %v3284_v1 = vor.u32 %v3631_v63, %v3283_v62  ;;  %v2957_v62 = vld [vmem:[%s4929_s3 + $0xc0] sm:$0xf0]  ;;  %v2963_v63 = vld [vmem:[%s4929_s3 + $0x88] sm:$0xf] }
  0x68   :  { %1273 = vmatpush.bf16.msrb.mxu2 %v3519_v2  ;;  %v3285_v2 = vld [vmem:[%s4929_s3 + $0x348] sm:$0xf0] }
  0x69   :  { %1289 = vmatpush.bf16.msrb.mxu3 %v3524_v4  ;;  %v3614_v4 = vld [vmem:[%s4929_s3 + $0x2bc] sm:$0xf0] }
  0x6a   :  { %1248 = vmatpush.bf16.msrb.mxu0 %v3502_v3  ;;  %v3211_v3 = vld [vmem:[%s4929_s3 + $0x280] sm:$0xf] }
  0x6b   :  { %1261 = vmatpush.bf16.msrb.mxu1 %v3510_v5  ;;  %v3288_v5 = vor.u32 %v3623_v0, %v3285_v2  ;;  %v3551_v0 = vld [vmem:[%s4929_s3 + $0xc4] sm:$0xf0] }
  0x6c   :  { %1274 = vmatpush.bf16.msrb.mxu2 %v3518_v6  ;;  %v3606_v6 = vld [vmem:[%s4929_s3 + $0x284] sm:$0xf]  ;;  %v2964_v2 = vor.u32 %v3551_v0, %v2963_v63  ;;  %v3600_v63 = vld [vmem:[%s4929_s3 + $0x24c] sm:$0xf0]  ;;  %v3592_v0 = vld [vmem:[%s4929_s3 + $0x214] sm:$0xf] }
  0x6d   :  { %1290 = vmatpush.bf16.msrb.mxu3 %v3523_v8  ;;  %v3219_v8 = vld [vmem:[%s4929_s3 + $0x288] sm:$0xf] }
  0x6e   :  { %1249 = vmatpush.bf16.msrb.mxu0 %v3501_v7  ;;  %v3213_v7 = vld [vmem:[%s4929_s3 + $0x2c0] sm:$0xf0] }
  0x6f   :  { %1262 = vmatpush.bf16.msrb.mxu1 %v3509_v9 }
  0x70   :  { %1275 = vmatpush.bf16.msrb.mxu2 %v3517_v10  ;;  %v3212_v10 = vor.u32 %v3614_v4, %v3211_v3  ;;  %v3543_v3 = vld [vmem:[%s4929_s3 + $0x8c] sm:$0xf] }
  0x71   :  { %1291 = vmatpush.bf16.msrb.mxu3 %v3522_v12  ;;  %v3607_v12 = vld [vmem:[%s4929_s3 + $0x28c] sm:$0xf] }
  0x72   :  { %1250 = vmatpush.bf16.msrb.mxu0 %v3500_v11  ;;  %v3615_v11 = vld [vmem:[%s4929_s3 + $0x2c4] sm:$0xf0]  ;;  %v2965_v4 = vld [vmem:[%s4929_s3 + $0xc8] sm:$0xf0] }
  0x73   :  { %1263 = vmatpush.bf16.msrb.mxu1 %v3508_v13  ;;  %v3221_v13 = vld [vmem:[%s4929_s3 + $0x2c8] sm:$0xf0] }
  0x74   :  { %1276 = vmatpush.bf16.msrb.mxu2 %v3516_v14  ;;  %v3216_v14 = vor.u32 %v3606_v6, %v3213_v7 }
  0x75   :  { %1292 = vmatpush.bf16.msrb.mxu3 %v3521_v16  ;;  %v3147_v16 = vld [vmem:[%s4929_s3 + $0x200] sm:$0xf] }
  0x76   :  { %1251 = vmatpush.bf16.msrb.mxu0 %v3499_v15  ;;  %v3220_v15 = vor.u32 %v3615_v11, %v3219_v8  ;;  %v2968_v8 = vor.u32 %v3543_v3, %v2965_v4  ;;  %v2893_v11 = vld [vmem:[%s4929_s3 + $0x40] sm:$0xf0]  ;;  %v3171_v3 = vld [vmem:[%s4929_s3 + $0x218] sm:$0xf] }
  0x77   :  { %1264 = vmatpush.bf16.msrb.mxu1 %v3507_v18  ;;  %v3590_v18 = vld [vmem:[%s4929_s3 + $0x204] sm:$0xf]  ;;  %v3601_v4 = vld [vmem:[%s4929_s3 + $0x254] sm:$0xf0] }
  0x78   :  { %1277 = vmatpush.bf16.msrb.mxu2 %v3515_v19  ;;  %2888 = vmatmul.msk.bf16.vlgmr.msrb.gmra.mxu3 %vm1086_vm0, %v81_v20  ;;  %v3224_v19 = vor.u32 %v3607_v12, %v3221_v13  ;;  %v3149_v20 = vld [vmem:[%s4929_s3 + $0x240] sm:$0xf0] }
  0x79   :  { %2104 = vmatpush.bf16.msra.mxu3 %v3340_v44  ;;  %v3152_v27 = vor.u32 %v3590_v18, %v3149_v20  ;;  %v3019_v44 = vld [vmem:[%s4929_s3 + $0x100] sm:$0xf]  ;;  %v3355_v20 = vld [vmem:[%s4929_s3 + $0x390] sm:$0xf] }
  0x7a   :  { %1252 = vmatpush.bf16.msrb.mxu0 %v3498_v21  ;;  %v3155_v21 = vld [vmem:[%s4929_s3 + $0x208] sm:$0xf]  ;;  %v3020_v47 = vor.u32 %v3566_v45, %v3019_v44  ;;  %v3625_v45 = vld [vmem:[%s4929_s3 + $0x31c] sm:$0xf] }
  0x7b   :  { %1265 = vmatpush.bf16.msrb.mxu1 %v3506_v22  ;;  %v3599_v22 = vld [vmem:[%s4929_s3 + $0x244] sm:$0xf0] }
  0x7c   :  { %1278 = vmatpush.bf16.msrb.mxu2 %v3514_v23 }
  0x7d   :  { %2105 = vmatpush.bf16.msra.mxu3 %v3276_v60  ;;  %v3542_v60 = vld [vmem:[%s4929_s3 + $0x84] sm:$0xf] }
  0x7e   :  { %1253 = vmatpush.bf16.msrb.mxu0 %v3497_v24  ;;  %v3591_v24 = vld [vmem:[%s4929_s3 + $0x20c] sm:$0xf] }
  0x7f   :  { %1266 = vmatpush.bf16.msrb.mxu1 %v3505_v26  ;;  %v3148_v26 = vor.u32 %v3598_v17, %v3147_v16  ;;  %v3160_v29 = vor.u32 %v3591_v24, %v3157_v25  ;;  %v3535_v16 = vld [vmem:[%s4929_s3 + $0x44] sm:$0xf0]  ;;  %v3527_v17 = vld [vmem:[%s4929_s3 + $0xc] sm:$0xf]  ;;  %v3640_v24 = vld [vmem:[%s4929_s3 + $0x394] sm:$0xf] }
  0x80   :  { %1279 = vmatpush.bf16.msrb.mxu2 %v3513_v28  ;;  %v3156_v28 = vor.u32 %v3599_v22, %v3155_v21  ;;  %v3648_v21 = vld [vmem:[%s4929_s3 + $0x3cc] sm:$0xf0]  ;;  %v3357_v25 = vld [vmem:[%s4929_s3 + $0x3d0] sm:$0xf0] }
  0x81   :  { %1254 = vmatmul.bf16.vlgmr.msrb.gmra.mxu0 %v78_v30  ;;  %2106 = vmatpush.bf16.msra.mxu3 %v3212_v10  ;;  %v3083_v30 = vld [vmem:[%s4929_s3 + $0x180] sm:$0xf]  ;;  %v3526_v10 = vld [vmem:[%s4929_s3 + $0x4] sm:$0xf] }
  0x82   :  { %1267 = vmatmul.bf16.vlgmr.msrb.gmra.mxu1 %v79_v31  ;;  %2117 = vmatpush.bf16.msra.mxu0 %v3344_v50  ;;  %v3582_v31 = vld [vmem:[%s4929_s3 + $0x1bc] sm:$0xf0]  ;;  %v3567_v50 = vld [vmem:[%s4929_s3 + $0x144] sm:$0xf0] }
  0x83   :  { %1280 = vmatmul.bf16.vlgmr.msrb.gmra.mxu2 %v80_v32  ;;  %2130 = vmatpush.bf16.msra.mxu1 %v3348_v51  ;;  %v3574_v32 = vld [vmem:[%s4929_s3 + $0x184] sm:$0xf] }
  0x84   :  { %2143 = vmatpush.bf16.msra.mxu2 %v3352_v56  ;;  %v3032_v56 = vor.u32 %v3559_v53, %v3029_v54  ;;  %v3235_v53 = vld [vmem:[%s4929_s3 + $0x298] sm:$0xf] }
  0x85   :  { %2107 = vmatpush.bf16.msra.mxu3 %v3148_v26  ;;  %v3363_v26 = vld [vmem:[%s4929_s3 + $0x398] sm:$0xf] }
  0x86   :  { %2118 = vmatpush.bf16.msra.mxu0 %v3280_v61  ;;  %v2956_v61 = vor.u32 %v3550_v59, %v2955_v58  ;;  %v3617_v54 = vld [vmem:[%s4929_s3 + $0x2d4] sm:$0xf0]  ;;  %v3237_v59 = vld [vmem:[%s4929_s3 + $0x2d8] sm:$0xf0] }
  0x87   :  { %2131 = vmatpush.bf16.msra.mxu1 %v3284_v1  ;;  %v2960_v1 = vor.u32 %v3542_v60, %v2957_v62  ;;  %v3163_v62 = vld [vmem:[%s4929_s3 + $0x210] sm:$0xf] }
  0x88   :  { %2144 = vmatpush.bf16.msra.mxu2 %v3288_v5  ;;  %v2891_v5 = vld [vmem:[%s4929_s3] sm:$0xf] }
  0x8a   :  { %2119 = vmatpush.bf16.msra.mxu0 %v3216_v14  ;;  %v2896_v14 = vor.u32 %v3526_v10, %v2893_v11  ;;  %v3172_v10 = vor.u32 %v3601_v4, %v3171_v3  ;;  %v2917_v3 = vld [vmem:[%s4929_s3 + $0x58] sm:$0xf0] }
  0x8b   :  { %2132 = vmatpush.bf16.msra.mxu1 %v3220_v15  ;;  %v2899_v15 = vld [vmem:[%s4929_s3 + $0x8] sm:$0xf] }
  0x8c   :  { %2145 = vmatpush.bf16.msra.mxu2 %v3224_v19  ;;  %v2900_v18 = vor.u32 %v3535_v16, %v2899_v15  ;;  %v2901_v19 = vld [vmem:[%s4929_s3 + $0x48] sm:$0xf0]  ;;  %v3101_v16 = vld [vmem:[%s4929_s3 + $0x1d0] sm:$0xf0] }
  0x8d   :  { %v2904_v22 = vor.u32 %v3527_v17, %v2901_v19  ;;  %v3107_v17 = vld [vmem:[%s4929_s3 + $0x198] sm:$0xf] }
  0x8e   :  { %2120 = vmatpush.bf16.msra.mxu0 %v3152_v27  ;;  %v3360_v27 = vor.u32 %v3640_v24, %v3357_v25 }
  0x8f   :  { %2133 = vmatpush.bf16.msra.mxu1 %v3156_v28  ;;  %v3649_v28 = vld [vmem:[%s4929_s3 + $0x3d4] sm:$0xf0] }
  0x90   :  { %2146 = vmatpush.bf16.msra.mxu2 %v3160_v29  ;;  %v3641_v29 = vld [vmem:[%s4929_s3 + $0x39c] sm:$0xf] }
  0x9e   :  { %v1099_v34 = vpop.f32.mrf.mxu0 }
  0x9f   :  { %v1100_v35 = vadd.f32 %v3654_v33, %v1099_v34  ;;  %v1112_v36 = vpop.f32.mrf.mxu1  ;;  %v3084_v33 = vor.u32 %v3582_v31, %v3083_v30  ;;  %v3085_v34 = vld [vmem:[%s4929_s3 + $0x1c0] sm:$0xf0]  ;;  %v3365_v30 = vld [vmem:[%s4929_s3 + $0x3d8] sm:$0xf0] }
  0xa1   :  { %v1113_v37 = vadd.f32 %v1112_v36, %v1100_v35  ;;  %v3091_v35 = vld [vmem:[%s4929_s3 + $0x188] sm:$0xf]  ;;  %2108 = vmatpush.bf16.msra.mxu3 %v3084_v33  ;;  %v3368_v33 = vor.u32 %v3641_v29, %v3365_v30  ;;  %v3037_v30 = vld [vmem:[%s4929_s3 + $0x150] sm:$0xf0] }
  0xa2   :  { %v3583_v36 = vld [vmem:[%s4929_s3 + $0x1c4] sm:$0xf0] }
  0xa5   :  { %2109 = vmatpush.bf16.msra.mxu3 %v3020_v47  ;;  %v3227_v47 = vld [vmem:[%s4929_s3 + $0x290] sm:$0xf] }
  0xa6   :  { %v1125_v38 = vpop.f32.mrf.mxu2  ;;  %v1101_v40 = vpop.f32.mrf.mxu0 }
  0xa7   :  { %v1126_v39 = vadd.f32 %v1125_v38, %v1113_v37  ;;  %v1138_v48 = vpop.f32.mrf.mxu3  ;;  %v1114_v49 = vpop.f32.mrf.mxu1  ;;  %v3088_v37 = vor.u32 %v3574_v32, %v3085_v34  ;;  %v3092_v38 = vor.u32 %v3583_v36, %v3091_v35  ;;  %v3093_v40 = vld [vmem:[%s4929_s3 + $0x1c8] sm:$0xf0]  ;;  %v3364_v32 = vor.u32 %v3649_v28, %v3363_v26  ;;  %v3291_v34 = vld [vmem:[%s4929_s3 + $0x310] sm:$0xf]  ;;  %v3624_v36 = vld [vmem:[%s4929_s3 + $0x314] sm:$0xf] }
  0xa8   :  { %v3027_v49 = vld [vmem:[%s4929_s3 + $0x108] sm:$0xf]  ;;  %v3632_v35 = vld [vmem:[%s4929_s3 + $0x34c] sm:$0xf0]  ;;  %v3560_v28 = vld [vmem:[%s4929_s3 + $0x114] sm:$0xf] }
  0xa9   :  { %v4114_v55 = vadd.f32 %v1138_v48, %v1126_v39  ;;  %v3575_v39 = vld [vmem:[%s4929_s3 + $0x18c] sm:$0xf]  ;;  %2121 = vmatpush.bf16.msra.mxu0 %v3088_v37  ;;  %2134 = vmatpush.bf16.msra.mxu1 %v3092_v38  ;;  %v3021_v48 = vld [vmem:[%s4929_s3 + $0x140] sm:$0xf0]  ;;  %v3028_v52 = vor.u32 %v3567_v50, %v3027_v49  ;;  %v3292_v37 = vor.u32 %v3632_v35, %v3291_v34  ;;  %v3293_v38 = vld [vmem:[%s4929_s3 + $0x350] sm:$0xf0] }
  0xaa   :  { %v3096_v42 = vor.u32 %v3575_v39, %v3093_v40  ;;  %v3024_v51 = vor.u32 %v3558_v46, %v3021_v48  ;;  %2110 = vmatpush.bf16.msra.mxu3 %v2956_v61  ;;  %v3299_v39 = vld [vmem:[%s4929_s3 + $0x318] sm:$0xf]  ;;  %v3301_v46 = vld [vmem:[%s4929_s3 + $0x358] sm:$0xf0]  ;;  %v3616_v50 = vld [vmem:[%s4929_s3 + $0x2cc] sm:$0xf0]  ;;  %v3236_v61 = vor.u32 %v3617_v54, %v3235_v53 }
  0xab   :  { %v3633_v40 = vld [vmem:[%s4929_s3 + $0x354] sm:$0xf0]  ;;  %v3304_v49 = vor.u32 %v3625_v45, %v3301_v46  ;;  %v3228_v58 = vor.u32 %v3616_v50, %v3227_v47  ;;  %v3035_v26 = vld [vmem:[%s4929_s3 + $0x110] sm:$0xf]  ;;  %v3561_v35 = vld [vmem:[%s4929_s3 + $0x11c] sm:$0xf] }
  0xac   :  { %2147 = vmatpush.bf16.msra.mxu2 %v3096_v42  ;;  %v3296_v42 = vor.u32 %v3624_v36, %v3293_v38  ;;  %v3300_v44 = vor.u32 %v3633_v40, %v3299_v39  ;;  %v3045_v36 = vld [vmem:[%s4929_s3 + $0x158] sm:$0xf0]  ;;  %v2971_v39 = vld [vmem:[%s4929_s3 + $0x90] sm:$0xf]  ;;  %v3553_v46 = vld [vmem:[%s4929_s3 + $0xd4] sm:$0xf0] }
  0xad   :  { %2122 = vmatpush.bf16.msra.mxu0 %v3024_v51  ;;  %2135 = vmatpush.bf16.msra.mxu1 %v3028_v52  ;;  %v3608_v51 = vld [vmem:[%s4929_s3 + $0x294] sm:$0xf]  ;;  %v3552_v40 = vld [vmem:[%s4929_s3 + $0xcc] sm:$0xf0]  ;;  %v3545_v50 = vld [vmem:[%s4929_s3 + $0x9c] sm:$0xf] }
  0xae   :  { %v1127_v9 = vpop.f32.mrf.mxu2  ;;  %v3229_v52 = vld [vmem:[%s4929_s3 + $0x2d0] sm:$0xf0]  ;;  %v2972_v45 = vor.u32 %v3552_v40, %v2971_v39  ;;  %v3626_v40 = vld [vmem:[%s4929_s3 + $0x324] sm:$0xf] }
  0xaf   :  { %v1140_v23 = vpop.f32.mrf.mxu3  ;;  %v3534_v9 = vld [vmem:[%s4929_s3 + $0x3c] sm:$0xf0]  ;;  %v3232_v60 = vor.u32 %v3608_v51, %v3229_v52  ;;  %v2981_v51 = vld [vmem:[%s4929_s3 + $0xd8] sm:$0xf0] }
  0xb0   :  { %2148 = vmatpush.bf16.msra.mxu2 %v3032_v56  ;;  %v2892_v13 = vor.u32 %v3534_v9, %v2891_v5  ;;  %v3356_v23 = vor.u32 %v3648_v21, %v3355_v20  ;;  %v3609_v56 = vld [vmem:[%s4929_s3 + $0x29c] sm:$0xf]  ;;  %v2984_v54 = vor.u32 %v3545_v50, %v2981_v51 }
  0xb1   :  { %2123 = vmatpush.bf16.msra.mxu0 %v2960_v1  ;;  %2136 = vmatpush.bf16.msra.mxu1 %v2964_v2  ;;  %v3240_v1 = vor.u32 %v3609_v56, %v3237_v59  ;;  %v3165_v2 = vld [vmem:[%s4929_s3 + $0x250] sm:$0xf0]  ;;  %v3593_v5 = vld [vmem:[%s4929_s3 + $0x21c] sm:$0xf]  ;;  %v3536_v59 = vld [vmem:[%s4929_s3 + $0x4c] sm:$0xf0] }
  0xb2   :  { %2111 = vmatpush.bf16.msra.mxu3 %v2892_v13  ;;  %v3168_v9 = vor.u32 %v3592_v0, %v3165_v2  ;;  %v3584_v13 = vld [vmem:[%s4929_s3 + $0x1cc] sm:$0xf0]  ;;  %v3529_v2 = vld [vmem:[%s4929_s3 + $0x1c] sm:$0xf] }
  0xb3   :  { %v2920_v4 = vor.u32 %v3529_v2, %v2917_v3  ;;  %v3181_v2 = vld [vmem:[%s4929_s3 + $0x260] sm:$0xf0]  ;;  %v3187_v3 = vld [vmem:[%s4929_s3 + $0x228] sm:$0xf] }
  0xb4   :  { %2149 = vmatpush.bf16.msra.mxu2 %v2968_v8  ;;  %v3164_v8 = vor.u32 %v3600_v63, %v3163_v62  ;;  %v2915_v62 = vld [vmem:[%s4929_s3 + $0x18] sm:$0xf] }
  0xb5   :  { %2124 = vmatpush.bf16.msra.mxu0 %v2896_v14  ;;  %2137 = vmatpush.bf16.msra.mxu1 %v2900_v18  ;;  %v3576_v14 = vld [vmem:[%s4929_s3 + $0x194] sm:$0xf]  ;;  %v3585_v18 = vld [vmem:[%s4929_s3 + $0x1d4] sm:$0xf0] }
  0xb6   :  { %2156 = vmatpush.bf16.msrb.mxu3 %v3356_v23  ;;  %v3104_v20 = vor.u32 %v3576_v14, %v3101_v16  ;;  %v3108_v21 = vor.u32 %v3585_v18, %v3107_v17  ;;  %v3109_v23 = vld [vmem:[%s4929_s3 + $0x1d8] sm:$0xf0]  ;;  %v3537_v63 = vld [vmem:[%s4929_s3 + $0x54] sm:$0xf0] }
  0xb8   :  { %2150 = vmatpush.bf16.msra.mxu2 %v2904_v22  ;;  %v3577_v22 = vld [vmem:[%s4929_s3 + $0x19c] sm:$0xf] }
  0xb9   :  { %2169 = vmatpush.bf16.msrb.mxu0 %v3360_v27  ;;  %2182 = vmatpush.bf16.msrb.mxu1 %v3364_v32  ;;  %v3112_v25 = vor.u32 %v3577_v22, %v3109_v23  ;;  %v3568_v27 = vld [vmem:[%s4929_s3 + $0x14c] sm:$0xf0]  ;;  %v3569_v32 = vld [vmem:[%s4929_s3 + $0x154] sm:$0xf0] }
  0xba   :  { %2157 = vmatpush.bf16.msrb.mxu3 %v3292_v37  ;;  %v3036_v29 = vor.u32 %v3568_v27, %v3035_v26  ;;  %v3048_v37 = vor.u32 %v3561_v35, %v3045_v36  ;;  %v3373_v26 = vld [vmem:[%s4929_s3 + $0x3e0] sm:$0xf0]  ;;  %v3379_v27 = vld [vmem:[%s4929_s3 + $0x3a8] sm:$0xf]  ;;  %v3307_v35 = vld [vmem:[%s4929_s3 + $0x320] sm:$0xf] }
  0xbb   :  { %v3634_v36 = vld [vmem:[%s4929_s3 + $0x35c] sm:$0xf0] }
  0xbc   :  { %2195 = vmatpush.bf16.msrb.mxu2 %v3368_v33  ;;  %v3040_v33 = vor.u32 %v3560_v28, %v3037_v30  ;;  %v3651_v28 = vld [vmem:[%s4929_s3 + $0x3e4] sm:$0xf0]  ;;  %v3643_v30 = vld [vmem:[%s4929_s3 + $0x3ac] sm:$0xf] }
  0xbd   :  { %2170 = vmatpush.bf16.msrb.mxu0 %v3296_v42  ;;  %2183 = vmatpush.bf16.msrb.mxu1 %v3300_v44  ;;  %v3544_v42 = vld [vmem:[%s4929_s3 + $0x94] sm:$0xf] }
  0xbe   :  { %v4209_v41 = vpop.f32.mrf.mxu0  ;;  %2158 = vmatpush.bf16.msrb.mxu3 %v3228_v58  ;;  %v2907_v58 = vld [vmem:[%s4929_s3 + $0x10] sm:$0xf] }
  0xbf   :  { %v4211_v43 = vpop.f32.mrf.mxu1  ;;  %v1152_v38 = vadd.f32 %v4209_v41, %v4114_v55  ;;  %v2973_v55 = vld [vmem:[%s4929_s3 + $0xd0] sm:$0xf0]  ;;  %v2979_v41 = vld [vmem:[%s4929_s3 + $0x98] sm:$0xf] }
  0xc0   :  { %2196 = vmatpush.bf16.msrb.mxu2 %v3304_v49  ;;  %v2980_v49 = vor.u32 %v3553_v46, %v2979_v41  ;;  %v3317_v41 = vld [vmem:[%s4929_s3 + $0x368] sm:$0xf0]  ;;  %v3308_v46 = vor.u32 %v3634_v36, %v3307_v35 }
  0xc1   :  { %2171 = vmatpush.bf16.msrb.mxu0 %v3232_v60  ;;  %2184 = vmatpush.bf16.msrb.mxu1 %v3236_v61  ;;  %v1165_v56 = vadd.f32 %v4211_v43, %v1152_v38  ;;  %v3528_v60 = vld [vmem:[%s4929_s3 + $0x14] sm:$0xf]  ;;  %v2908_v61 = vor.u32 %v3536_v59, %v2907_v58  ;;  %v3380_v38 = vor.u32 %v3651_v28, %v3379_v27  ;;  %v3611_v58 = vld [vmem:[%s4929_s3 + $0x2ac] sm:$0xf]  ;;  %v3571_v27 = vld [vmem:[%s4929_s3 + $0x164] sm:$0xf0] }
  0xc2   :  { %2159 = vmatpush.bf16.msrb.mxu3 %v3164_v8  ;;  %v2909_v43 = vld [vmem:[%s4929_s3 + $0x50] sm:$0xf0]  ;;  %v3253_v59 = vld [vmem:[%s4929_s3 + $0x2e8] sm:$0xf0] }
  0xc3   :  { %v2912_v0 = vor.u32 %v3528_v60, %v2909_v43  ;;  %v3179_v43 = vld [vmem:[%s4929_s3 + $0x220] sm:$0xf]  ;;  %v3563_v28 = vld [vmem:[%s4929_s3 + $0x12c] sm:$0xf] }
  0xc4   :  { %2197 = vmatpush.bf16.msrb.mxu2 %v3240_v1  ;;  %v2916_v1 = vor.u32 %v3537_v63, %v2915_v62  ;;  %v3602_v62 = vld [vmem:[%s4929_s3 + $0x25c] sm:$0xf0] }
  0xc5   :  { %2172 = vmatpush.bf16.msrb.mxu0 %v3168_v9  ;;  %2185 = vmatpush.bf16.msrb.mxu1 %v3172_v10 }
  0xc6   :  { %v4237_v57 = vpop.f32.mrf.mxu2  ;;  %v1153_v7 = vpop.f32.mrf.mxu0 }
  0xc7   :  { %v4266_v6 = vpop.f32.mrf.mxu3  ;;  %v1166_v12 = vpop.f32.mrf.mxu1  ;;  %v3173_v7 = vld [vmem:[%s4929_s3 + $0x258] sm:$0xf0] }
  0xc8   :  { %v3176_v11 = vor.u32 %v3593_v5, %v3173_v7  ;;  %v3099_v12 = vld [vmem:[%s4929_s3 + $0x190] sm:$0xf]  ;;  %v1178_v5 = vadd.f32 %v4237_v57, %v1165_v56  ;;  %v3619_v56 = vld [vmem:[%s4929_s3 + $0x2e4] sm:$0xf0] }
  0xc9   :  { %v3100_v15 = vor.u32 %v3584_v13, %v3099_v12  ;;  %2173 = vmatpush.bf16.msrb.mxu0 %v3104_v20  ;;  %2186 = vmatpush.bf16.msrb.mxu1 %v3108_v21 }
  0xca   :  { %2198 = vmatpush.bf16.msrb.mxu2 %v3176_v11  ;;  %v1191_v9 = vadd.f32 %v4266_v6, %v1178_v5  ;;  %v3371_v6 = vld [vmem:[%s4929_s3 + $0x3a0] sm:$0xf]  ;;  %v3595_v5 = vld [vmem:[%s4929_s3 + $0x22c] sm:$0xf] }
  0xcb   :  { %2160 = vmatpush.bf16.msrb.mxu3 %v3100_v15 }
  0xcd   :  { %2174 = vmatpush.bf16.msrb.mxu0 %v3040_v33 }
  0xce   :  { %v1179_v31 = vpop.f32.mrf.mxu2  ;;  %2199 = vmatpush.bf16.msrb.mxu2 %v3112_v25 }
  0xcf   :  { %v1192_v48 = vpop.f32.mrf.mxu3  ;;  %v3043_v31 = vld [vmem:[%s4929_s3 + $0x118] sm:$0xf]  ;;  %2161 = vmatpush.bf16.msrb.mxu3 %v3036_v29 }
  0xd0   :  { %v3044_v34 = vor.u32 %v3569_v32, %v3043_v31  ;;  %v2976_v48 = vor.u32 %v3544_v42, %v2973_v55  ;;  %v3381_v31 = vld [vmem:[%s4929_s3 + $0x3e8] sm:$0xf0]  ;;  %v3309_v42 = vld [vmem:[%s4929_s3 + $0x360] sm:$0xf0] }
  0xd1   :  { %v3384_v39 = vor.u32 %v3643_v30, %v3381_v31  ;;  %v3627_v55 = vld [vmem:[%s4929_s3 + $0x32c] sm:$0xf] }
  0xd2   :  { %2187 = vmatpush.bf16.msrb.mxu1 %v3044_v34  ;;  %2200 = vmatpush.bf16.msrb.mxu2 %v3048_v37  ;;  %v3320_v51 = vor.u32 %v3627_v55, %v3317_v41 }
  0xd3   :  { %2162 = vmatpush.bf16.msrb.mxu3 %v2972_v45  ;;  %2175 = vmatpush.bf16.msrb.mxu0 %v2976_v48  ;;  %v3635_v45 = vld [vmem:[%s4929_s3 + $0x364] sm:$0xf0]  ;;  %v3243_v48 = vld [vmem:[%s4929_s3 + $0x2a0] sm:$0xf] }
  0xd6   :  { %2188 = vmatpush.bf16.msrb.mxu1 %v2980_v49  ;;  %2201 = vmatpush.bf16.msrb.mxu2 %v2984_v54  ;;  %v3618_v49 = vld [vmem:[%s4929_s3 + $0x2dc] sm:$0xf0]  ;;  %v3251_v54 = vld [vmem:[%s4929_s3 + $0x2a8] sm:$0xf] }
  0xd7   :  { %2163 = vmatpush.bf16.msrb.mxu3 %v2908_v61  ;;  %2176 = vmatpush.bf16.msrb.mxu0 %v2912_v0  ;;  %v3244_v60 = vor.u32 %v3618_v49, %v3243_v48  ;;  %v3252_v63 = vor.u32 %v3619_v56, %v3251_v54  ;;  %v3256_v0 = vor.u32 %v3611_v58, %v3253_v59  ;;  %v2925_v48 = vld [vmem:[%s4929_s3 + $0x60] sm:$0xf0]  ;;  %v2933_v54 = vld [vmem:[%s4929_s3 + $0x68] sm:$0xf0]  ;;  %v3387_v56 = vld [vmem:[%s4929_s3 + $0x3b0] sm:$0xf] }
  0xd8   :  { %v3652_v58 = vld [vmem:[%s4929_s3 + $0x3ec] sm:$0xf0]  ;;  %v3644_v59 = vld [vmem:[%s4929_s3 + $0x3b4] sm:$0xf] }
  0xda   :  { %2189 = vmatpush.bf16.msrb.mxu1 %v2916_v1  ;;  %2202 = vmatpush.bf16.msrb.mxu2 %v2920_v4  ;;  %v3594_v1 = vld [vmem:[%s4929_s3 + $0x224] sm:$0xf]  ;;  %v3603_v4 = vld [vmem:[%s4929_s3 + $0x264] sm:$0xf0] }
  0xde   :  { %v4403_v19 = vpop.f32.mrf.mxu0 }
  0xdf   :  { %v4411_v24 = vpop.f32.mrf.mxu1  ;;  %v1204_v10 = vadd.f32 %v4403_v19, %v1191_v9  ;;  %v3650_v19 = vld [vmem:[%s4929_s3 + $0x3dc] sm:$0xf0]  ;;  %v3184_v9 = vor.u32 %v3594_v1, %v3181_v2  ;;  %v3397_v1 = vld [vmem:[%s4929_s3 + $0x3f8] sm:$0xf0] }
  0xe0   :  { %v3372_v33 = vor.u32 %v3650_v19, %v3371_v6  ;;  %v3562_v19 = vld [vmem:[%s4929_s3 + $0x124] sm:$0xf] }
  0xe1   :  { %v1217_v11 = vadd.f32 %v4411_v24, %v1204_v10  ;;  %v3642_v24 = vld [vmem:[%s4929_s3 + $0x3a4] sm:$0xf]  ;;  %v3115_v10 = vld [vmem:[%s4929_s3 + $0x1a0] sm:$0xf] }
  0xe2   :  { %v3376_v34 = vor.u32 %v3642_v24, %v3373_v26  ;;  %v3053_v24 = vld [vmem:[%s4929_s3 + $0x160] sm:$0xf0]  ;;  %v3059_v26 = vld [vmem:[%s4929_s3 + $0x128] sm:$0xf] }
  0xe3   :  { %v3056_v31 = vor.u32 %v3562_v19, %v3053_v24  ;;  %v3060_v35 = vor.u32 %v3571_v27, %v3059_v26  ;;  %v3621_v19 = vld [vmem:[%s4929_s3 + $0x2f4] sm:$0xf0]  ;;  %v3613_v24 = vld [vmem:[%s4929_s3 + $0x2bc] sm:$0xf] }
  0xe4   :  { %v3269_v26 = vld [vmem:[%s4929_s3 + $0x2f8] sm:$0xf0] }
  0xe6   :  { %v1229_v44 = vpop.f32.mrf.mxu2  ;;  %v1205_v47 = vpop.f32.mrf.mxu0 }
  0xe7   :  { %v1242_v52 = vpop.f32.mrf.mxu3  ;;  %v1218_v53 = vpop.f32.mrf.mxu1  ;;  %v1230_v12 = vadd.f32 %v1229_v44, %v1217_v11  ;;  %v3315_v44 = vld [vmem:[%s4929_s3 + $0x328] sm:$0xf]  ;;  %v3312_v47 = vor.u32 %v3626_v40, %v3309_v42  ;;  %v3586_v11 = vld [vmem:[%s4929_s3 + $0x1dc] sm:$0xf0]  ;;  %v3547_v42 = vld [vmem:[%s4929_s3 + $0xac] sm:$0xf] }
  0xe8   :  { %v3316_v50 = vor.u32 %v3635_v45, %v3315_v44  ;;  %v3245_v53 = vld [vmem:[%s4929_s3 + $0x2e0] sm:$0xf0]  ;;  %v3555_v40 = vld [vmem:[%s4929_s3 + $0xe4] sm:$0xf0]  ;;  %v2997_v44 = vld [vmem:[%s4929_s3 + $0xe8] sm:$0xf0] }
  0xe9   :  { %v1243_v15 = vadd.f32 %v1242_v52, %v1230_v12  ;;  %v3610_v52 = vld [vmem:[%s4929_s3 + $0x2a4] sm:$0xf]  ;;  %v3188_v12 = vor.u32 %v3603_v4, %v3187_v3  ;;  %v2923_v45 = vld [vmem:[%s4929_s3 + $0x20] sm:$0xf]  ;;  %v3388_v4 = vor.u32 %v3652_v58, %v3387_v56  ;;  %v3572_v56 = vld [vmem:[%s4929_s3 + $0x16c] sm:$0xf0] }
  0xea   :  { %v3248_v61 = vor.u32 %v3610_v52, %v3245_v53  ;;  %v3539_v52 = vld [vmem:[%s4929_s3 + $0x64] sm:$0xf0]  ;;  %v3531_v53 = vld [vmem:[%s4929_s3 + $0x2c] sm:$0xf] }
  0xeb   :  { %v2936_v3 = vor.u32 %v3531_v53, %v2933_v54  ;;  %v3067_v54 = vld [vmem:[%s4929_s3 + $0x130] sm:$0xf] }
  0xee   :  { %v1231_v7 = vpop.f32.mrf.mxu2 }
  0xef   :  { %v1244_v8 = vpop.f32.mrf.mxu3  ;;  %v3189_v7 = vld [vmem:[%s4929_s3 + $0x268] sm:$0xf0] }
  0xf0   :  { %v3180_v8 = vor.u32 %v3602_v62, %v3179_v43 }
  0xfb   :  { %v1294_v13 = vpop.f32.mrf.mxu3 }
  0xfe   :  { %v1255_v14 = vpop.f32.mrf.mxu0 }
  0xff   :  { %v1268_v16 = vpop.f32.mrf.mxu1  ;;  %v1256_v17 = vadd.f32 %v1255_v14, %v1243_v15  ;;  %v3578_v14 = vld [vmem:[%s4929_s3 + $0x1a4] sm:$0xf] }
 0x100   :  { %v3117_v15 = vld [vmem:[%s4929_s3 + $0x1e0] sm:$0xf0] }
 0x101   :  { %v1269_v57 = vadd.f32 %v1268_v16, %v1256_v17  ;;  %v3123_v16 = vld [vmem:[%s4929_s3 + $0x1a8] sm:$0xf] }
 0x102   :  { %v3587_v17 = vld [vmem:[%s4929_s3 + $0x1e4] sm:$0xf0] }
 0x103   :  { %v1296_v18 = vpop.f32.mrf.mxu3 }
 0x104   :  { %v3579_v18 = vld [vmem:[%s4929_s3 + $0x1ac] sm:$0xf] }
 0x106   :  { %v1281_v20 = vpop.f32.mrf.mxu2  ;;  %v1257_v21 = vpop.f32.mrf.mxu0 }
 0x107   :  { %v1282_v22 = vadd.f32 %v1281_v20, %v1269_v57  ;;  %v1270_v23 = vpop.f32.mrf.mxu1  ;;  %v3125_v57 = vld [vmem:[%s4929_s3 + $0x1e8] sm:$0xf0]  ;;  %v3116_v20 = vor.u32 %v3586_v11, %v3115_v10  ;;  %v3120_v21 = vor.u32 %v3578_v14, %v3117_v15  ;;  %v3628_v11 = vld [vmem:[%s4929_s3 + $0x334] sm:$0xf]  ;;  %v3637_v14 = vld [vmem:[%s4929_s3 + $0x374] sm:$0xf0] }
 0x108   :  { %v3570_v23 = vld [vmem:[%s4929_s3 + $0x15c] sm:$0xf0]  ;;  %v3128_v6 = vor.u32 %v3579_v18, %v3125_v57  ;;  %v3629_v15 = vld [vmem:[%s4929_s3 + $0x33c] sm:$0xf]  ;;  %v3259_v57 = vld [vmem:[%s4929_s3 + $0x2b0] sm:$0xf] }
 0x109   :  { %v1295_v25 = vadd.f32 %v1294_v13, %v1282_v22  ;;  %v3192_v13 = vor.u32 %v3595_v5, %v3189_v7  ;;  %v3051_v22 = vld [vmem:[%s4929_s3 + $0x120] sm:$0xf]  ;;  %v3323_v7 = vld [vmem:[%s4929_s3 + $0x330] sm:$0xf] }
 0x10a   :  { %v3052_v30 = vor.u32 %v3570_v23, %v3051_v22  ;;  %v3612_v23 = vld [vmem:[%s4929_s3 + $0x2b4] sm:$0xf] }
 0x10b   :  { %v1298_v29 = vmax.f32 %v1295_v25, 0.0  ;;  %v3124_v25 = vor.u32 %v3587_v17, %v3123_v16  ;;  %v3333_v16 = vld [vmem:[%s4929_s3 + $0x378] sm:$0xf0] }
 0x10c   :  { %v3336_v22 = vor.u32 %v3629_v15, %v3333_v16  ;;  %v2939_v16 = vld [vmem:[%s4929_s3 + $0x30] sm:$0xf] }
 0x10d   :  { %v4516_v32 = vpack.c.bf16 %v1298_v29, %v1298_v29  ;;  %v3061_v29 = vld [vmem:[%s4929_s3 + $0x168] sm:$0xf0] }
 0x10e   :  { %v1283_v37 = vpop.f32.mrf.mxu2  ;;  %v3064_v36 = vor.u32 %v3563_v28, %v3061_v29  ;;  %v3195_v29 = vld [vmem:[%s4929_s3 + $0x230] sm:$0xf] }
 0x10f   :  { %2112 = vmatmul.bf16.vlgmr.msra.gmra.mxu3 %v4516_v32  ;;  %2125 = vmatmul.bf16.vlgmr.msra.gmra.mxu0 %v4516_v32  ;;  %v3546_v37 = vld [vmem:[%s4929_s3 + $0xa4] sm:$0xf] }
 0x110   :  { %2138 = vmatmul.bf16.vlgmr.msra.gmra.mxu1 %v4516_v32  ;;  %2151 = vmatmul.bf16.vlgmr.msra.gmra.mxu2 %v4516_v32 }
 0x111   :  { %2208 = vmatpush.bf16.msra.mxu3 %v3372_v33  ;;  %2221 = vmatpush.bf16.msra.mxu0 %v3376_v34  ;;  %v2987_v33 = vld [vmem:[%s4929_s3 + $0xa0] sm:$0xf] }
 0x112   :  { %2234 = vmatpush.bf16.msra.mxu1 %v3380_v38  ;;  %2247 = vmatpush.bf16.msra.mxu2 %v3384_v39  ;;  %v3554_v34 = vld [vmem:[%s4929_s3 + $0xdc] sm:$0xf0]  ;;  %v2989_v38 = vld [vmem:[%s4929_s3 + $0xe0] sm:$0xf0]  ;;  %v2995_v39 = vld [vmem:[%s4929_s3 + $0xa8] sm:$0xf] }
 0x113   :  { %v2988_v55 = vor.u32 %v3554_v34, %v2987_v33  ;;  %v2992_v41 = vor.u32 %v3546_v37, %v2989_v38  ;;  %v2996_v49 = vor.u32 %v3555_v40, %v2995_v39  ;;  %v3272_v33 = vor.u32 %v3613_v24, %v3269_v26  ;;  %v3596_v34 = vld [vmem:[%s4929_s3 + $0x234] sm:$0xf]  ;;  %v3605_v37 = vld [vmem:[%s4929_s3 + $0x274] sm:$0xf0]  ;;  %v3597_v38 = vld [vmem:[%s4929_s3 + $0x23c] sm:$0xf] }
 0x114   :  { %v3205_v39 = vld [vmem:[%s4929_s3 + $0x278] sm:$0xf0] }
 0x115   :  { %2209 = vmatpush.bf16.msra.mxu3 %v3308_v46  ;;  %2222 = vmatpush.bf16.msra.mxu0 %v3312_v47  ;;  %v3538_v46 = vld [vmem:[%s4929_s3 + $0x5c] sm:$0xf0]  ;;  %v3530_v47 = vld [vmem:[%s4929_s3 + $0x24] sm:$0xf] }
 0x116   :  { %2235 = vmatpush.bf16.msra.mxu1 %v3316_v50  ;;  %2248 = vmatpush.bf16.msra.mxu2 %v3320_v51  ;;  %v3000_v50 = vor.u32 %v3547_v42, %v2997_v44  ;;  %v2931_v51 = vld [vmem:[%s4929_s3 + $0x28] sm:$0xf]  ;;  %v2924_v43 = vor.u32 %v3538_v46, %v2923_v45  ;;  %v2928_v62 = vor.u32 %v3530_v47, %v2925_v48  ;;  %v3131_v44 = vld [vmem:[%s4929_s3 + $0x1b0] sm:$0xf]  ;;  %v3580_v46 = vld [vmem:[%s4929_s3 + $0x1b4] sm:$0xf] }
 0x117   :  { %v2932_v2 = vor.u32 %v3539_v52, %v2931_v51  ;;  %v3588_v45 = vld [vmem:[%s4929_s3 + $0x1ec] sm:$0xf0]  ;;  %v3133_v47 = vld [vmem:[%s4929_s3 + $0x1f0] sm:$0xf0]  ;;  %v3139_v48 = vld [vmem:[%s4929_s3 + $0x1b8] sm:$0xf] }
 0x118   :  { %v3141_v51 = vld [vmem:[%s4929_s3 + $0x1f8] sm:$0xf0]  ;;  %v3132_v52 = vor.u32 %v3588_v45, %v3131_v44  ;;  %v3136_v53 = vor.u32 %v3580_v46, %v3133_v47 }
 0x119   :  { %2210 = vmatpush.bf16.msra.mxu3 %v3244_v60  ;;  %2223 = vmatpush.bf16.msra.mxu0 %v3248_v61  ;;  %v3389_v60 = vld [vmem:[%s4929_s3 + $0x3f0] sm:$0xf0]  ;;  %v3395_v61 = vld [vmem:[%s4929_s3 + $0x3b8] sm:$0xf] }
 0x11a   :  { %2236 = vmatpush.bf16.msra.mxu1 %v3252_v63  ;;  %2249 = vmatpush.bf16.msra.mxu2 %v3256_v0  ;;  %v3653_v63 = vld [vmem:[%s4929_s3 + $0x3f4] sm:$0xf0]  ;;  %v3645_v0 = vld [vmem:[%s4929_s3 + $0x3bc] sm:$0xf]  ;;  %v3392_v5 = vor.u32 %v3644_v59, %v3389_v60  ;;  %v3564_v60 = vld [vmem:[%s4929_s3 + $0x134] sm:$0xf] }
 0x11b   :  { %v3400_v10 = vor.u32 %v3645_v0, %v3397_v1  ;;  %v3077_v0 = vld [vmem:[%s4929_s3 + $0x178] sm:$0xf0]  ;;  %v3068_v1 = vor.u32 %v3572_v56, %v3067_v54 }
 0x11d   :  { %2211 = vmatpush.bf16.msra.mxu3 %v3180_v8  ;;  %2224 = vmatpush.bf16.msra.mxu0 %v3184_v9  ;;  %v3636_v8 = vld [vmem:[%s4929_s3 + $0x36c] sm:$0xf0]  ;;  %v3396_v9 = vor.u32 %v3653_v63, %v3395_v61  ;;  %v3069_v61 = vld [vmem:[%s4929_s3 + $0x170] sm:$0xf0]  ;;  %v3565_v63 = vld [vmem:[%s4929_s3 + $0x13c] sm:$0xf] }
 0x11e   :  { %2237 = vmatpush.bf16.msra.mxu1 %v3188_v12  ;;  %2250 = vmatpush.bf16.msra.mxu2 %v3192_v13  ;;  %v3325_v12 = vld [vmem:[%s4929_s3 + $0x370] sm:$0xf0]  ;;  %v3331_v13 = vld [vmem:[%s4929_s3 + $0x338] sm:$0xf]  ;;  %v3324_v17 = vor.u32 %v3636_v8, %v3323_v7  ;;  %v3080_v7 = vor.u32 %v3565_v63, %v3077_v0 }
 0x11f   :  { %2164 = vmatmul.bf16.vlgmr.msrb.gmra.mxu3 %v4516_v32  ;;  %2177 = vmatmul.bf16.vlgmr.msrb.gmra.mxu0 %v4516_v32  ;;  %v3328_v18 = vor.u32 %v3628_v11, %v3325_v12  ;;  %v3548_v8 = vld [vmem:[%s4929_s3 + $0xb4] sm:$0xf]  ;;  %v3557_v11 = vld [vmem:[%s4929_s3 + $0xf4] sm:$0xf0]  ;;  %v3549_v12 = vld [vmem:[%s4929_s3 + $0xbc] sm:$0xf] }
 0x120   :  { %2190 = vmatmul.bf16.vlgmr.msrb.gmra.mxu1 %v4516_v32  ;;  %2203 = vmatmul.bf16.vlgmr.msrb.gmra.mxu2 %v4516_v32 }
 0x121   :  { %2212 = vmatpush.bf16.msra.mxu3 %v3116_v20  ;;  %2225 = vmatpush.bf16.msra.mxu0 %v3120_v21  ;;  %v3620_v20 = vld [vmem:[%s4929_s3 + $0x2ec] sm:$0xf0]  ;;  %v3332_v21 = vor.u32 %v3637_v14, %v3331_v13  ;;  %v3013_v13 = vld [vmem:[%s4929_s3 + $0xf8] sm:$0xf0] }
 0x122   :  { %2238 = vmatpush.bf16.msra.mxu1 %v3124_v25  ;;  %2251 = vmatpush.bf16.msra.mxu2 %v3128_v6  ;;  %v3261_v25 = vld [vmem:[%s4929_s3 + $0x2f0] sm:$0xf0]  ;;  %v3267_v6 = vld [vmem:[%s4929_s3 + $0x2b8] sm:$0xf]  ;;  %v3260_v27 = vor.u32 %v3620_v20, %v3259_v57  ;;  %v3016_v57 = vor.u32 %v3549_v12, %v3013_v13 }
 0x123   :  { %v3264_v28 = vor.u32 %v3612_v23, %v3261_v25  ;;  %v3532_v20 = vld [vmem:[%s4929_s3 + $0x34] sm:$0xf]  ;;  %v3541_v23 = vld [vmem:[%s4929_s3 + $0x74] sm:$0xf0]  ;;  %v3533_v25 = vld [vmem:[%s4929_s3 + $0x3c] sm:$0xf] }
 0x125   :  { %2213 = vmatpush.bf16.msra.mxu3 %v3052_v30  ;;  %2226 = vmatpush.bf16.msra.mxu0 %v3056_v31  ;;  %v3604_v30 = vld [vmem:[%s4929_s3 + $0x26c] sm:$0xf0]  ;;  %v3268_v31 = vor.u32 %v3621_v19, %v3267_v6  ;;  %v2949_v6 = vld [vmem:[%s4929_s3 + $0x78] sm:$0xf0] }
 0x126   :  { %2239 = vmatpush.bf16.msra.mxu1 %v3060_v35  ;;  %2252 = vmatpush.bf16.msra.mxu2 %v3064_v36  ;;  %v3197_v35 = vld [vmem:[%s4929_s3 + $0x270] sm:$0xf0]  ;;  %v3203_v36 = vld [vmem:[%s4929_s3 + $0x238] sm:$0xf]  ;;  %v3196_v40 = vor.u32 %v3604_v30, %v3195_v29 }
 0x127   :  { %v3200_v42 = vor.u32 %v3596_v34, %v3197_v35 }
 0x129   :  { %2214 = vmatpush.bf16.msra.mxu3 %v2988_v55  ;;  %2227 = vmatpush.bf16.msra.mxu0 %v2992_v41  ;;  %v3204_v55 = vor.u32 %v3605_v37, %v3203_v36  ;;  %v3208_v41 = vor.u32 %v3597_v38, %v3205_v39 }
 0x12a   :  { %2240 = vmatpush.bf16.msra.mxu1 %v2996_v49  ;;  %2253 = vmatpush.bf16.msra.mxu2 %v3000_v50  ;;  %v3589_v49 = vld [vmem:[%s4929_s3 + $0x1f4] sm:$0xf0]  ;;  %v3581_v50 = vld [vmem:[%s4929_s3 + $0x1bc] sm:$0xf] }
 0x12b   :  { %v3140_v58 = vor.u32 %v3589_v49, %v3139_v48  ;;  %v3144_v59 = vor.u32 %v3581_v50, %v3141_v51 }
 0x12d   :  { %2215 = vmatpush.bf16.msra.mxu3 %v2924_v43  ;;  %2228 = vmatpush.bf16.msra.mxu0 %v2928_v62  ;;  %v3075_v43 = vld [vmem:[%s4929_s3 + $0x138] sm:$0xf] }
 0x12e   :  { %2241 = vmatpush.bf16.msra.mxu1 %v2932_v2  ;;  %2254 = vmatpush.bf16.msra.mxu2 %v2936_v3  ;;  %v3573_v62 = vld [vmem:[%s4929_s3 + $0x174] sm:$0xf0]  ;;  %v3072_v2 = vor.u32 %v3564_v60, %v3069_v61  ;;  %v3003_v3 = vld [vmem:[%s4929_s3 + $0xb0] sm:$0xf] }
 0x130   :  { %2216 = vmatmul.bf16.vlgmr.msra.gmra.mxu3 %v4516_v32  ;;  %2229 = vmatmul.bf16.vlgmr.msra.gmra.mxu0 %v4516_v32 }
 0x131   :  { %2260 = vmatpush.bf16.msrb.mxu3 %v3388_v4  ;;  %2273 = vmatpush.bf16.msrb.mxu0 %v3392_v5  ;;  %v3556_v4 = vld [vmem:[%s4929_s3 + $0xec] sm:$0xf0]  ;;  %v3076_v5 = vor.u32 %v3573_v62, %v3075_v43 }
 0x132   :  { %2286 = vmatpush.bf16.msrb.mxu1 %v3396_v9  ;;  %2299 = vmatpush.bf16.msrb.mxu2 %v3400_v10  ;;  %v3005_v9 = vld [vmem:[%s4929_s3 + $0xf0] sm:$0xf0]  ;;  %v3011_v10 = vld [vmem:[%s4929_s3 + $0xb8] sm:$0xf]  ;;  %v3004_v14 = vor.u32 %v3556_v4, %v3003_v3 }
 0x133   :  { %2242 = vmatmul.bf16.vlgmr.msra.gmra.mxu1 %v4516_v32  ;;  %2255 = vmatmul.bf16.vlgmr.msra.gmra.mxu2 %v4516_v32  ;;  %v3008_v15 = vor.u32 %v3548_v8, %v3005_v9 }
 0x135   :  { %2261 = vmatpush.bf16.msrb.mxu3 %v3324_v17  ;;  %2274 = vmatpush.bf16.msrb.mxu0 %v3328_v18  ;;  %v3540_v17 = vld [vmem:[%s4929_s3 + $0x6c] sm:$0xf0]  ;;  %v3012_v18 = vor.u32 %v3557_v11, %v3011_v10 }
 0x136   :  { %2287 = vmatpush.bf16.msrb.mxu1 %v3332_v21  ;;  %2300 = vmatpush.bf16.msrb.mxu2 %v3336_v22  ;;  %v2941_v21 = vld [vmem:[%s4929_s3 + $0x70] sm:$0xf0]  ;;  %v2947_v22 = vld [vmem:[%s4929_s3 + $0x38] sm:$0xf]  ;;  %v2940_v19 = vor.u32 %v3540_v17, %v2939_v16 }
 0x137   :  { %v2944_v24 = vor.u32 %v3532_v20, %v2941_v21  ;;  %v2948_v26 = vor.u32 %v3541_v23, %v2947_v22 }
 0x139   :  { %2262 = vmatpush.bf16.msrb.mxu3 %v3260_v27  ;;  %2275 = vmatpush.bf16.msrb.mxu0 %v3264_v28  ;;  %v2952_v27 = vor.u32 %v3533_v25, %v2949_v6  ;;  %v1428_v28 = vld [vmem:[%s4930_s4] sm:$0xff] }
 0x13a   :  { %2288 = vmatpush.bf16.msrb.mxu1 %v3268_v31  ;;  %2301 = vmatpush.bf16.msrb.mxu2 %v3272_v33  ;;  %v1433_v29 = vperm.slane %v1428_v28, 1  ;;  %v1434_v31 = vperm.slane %v1428_v28, 2  ;;  %v1432_v34 = vperm.slane %v1428_v28, 0  ;;  %v1435_v37 = vperm.slane %v1428_v28, 3 }
 0x13b   :  { %v1437_v56 = vperm.slane %v1428_v28, 5  ;;  %v1436_v61 = vperm.slane %v1428_v28, 4  ;;  %v1439_v63 = vperm.slane %v1428_v28, 7 }
 0x13d   :  { %2263 = vmatpush.bf16.msrb.mxu3 %v3196_v40  ;;  %2276 = vmatpush.bf16.msrb.mxu0 %v3200_v42 }
 0x13e   :  { %2289 = vmatpush.bf16.msrb.mxu1 %v3204_v55  ;;  %2302 = vmatpush.bf16.msrb.mxu2 %v3208_v41 }
 0x141   :  { %2264 = vmatpush.bf16.msrb.mxu3 %v3132_v52  ;;  %2277 = vmatpush.bf16.msrb.mxu0 %v3136_v53 }
 0x142   :  { %2290 = vmatpush.bf16.msrb.mxu1 %v3140_v58  ;;  %2303 = vmatpush.bf16.msrb.mxu2 %v3144_v59  ;;  %v1438_v59 = vperm.slane %v1428_v28, 6 }
 0x145   :  { %2265 = vmatpush.bf16.msrb.mxu3 %v3068_v1  ;;  %2278 = vmatpush.bf16.msrb.mxu0 %v3072_v2 }
 0x146   :  { %2291 = vmatpush.bf16.msrb.mxu1 %v3076_v5  ;;  %2304 = vmatpush.bf16.msrb.mxu2 %v3080_v7 }
 0x149   :  { %2266 = vmatpush.bf16.msrb.mxu3 %v3004_v14  ;;  %2279 = vmatpush.bf16.msrb.mxu0 %v3008_v15 }
 0x14a   :  { %2292 = vmatpush.bf16.msrb.mxu1 %v3012_v18  ;;  %2305 = vmatpush.bf16.msrb.mxu2 %v3016_v57  ;;  %v1429_v57 = vld [vmem:[%s4930_s4 + $0x8] sm:$0xff] }
 0x14b   :  { %v1441_v20 = vperm.slane %v1429_v57, 1  ;;  %v1442_v22 = vperm.slane %v1429_v57, 2  ;;  %v1440_v25 = vperm.slane %v1429_v57, 0 }
 0x14d   :  { %2267 = vmatpush.bf16.msrb.mxu3 %v2940_v19  ;;  %2280 = vmatpush.bf16.msrb.mxu0 %v2944_v24  ;;  %v1443_v24 = vperm.slane %v1429_v57, 3 }
 0x14e   :  { %2293 = vmatpush.bf16.msrb.mxu1 %v2948_v26  ;;  %2306 = vmatpush.bf16.msrb.mxu2 %v2952_v27 }
 0x150   :  { %2268 = vmatmul.bf16.vlgmr.msrb.gmra.mxu3 %v4516_v32  ;;  %2281 = vmatmul.bf16.vlgmr.msrb.gmra.mxu0 %v4516_v32 }
 0x151   :  { %2294 = vmatmul.bf16.vlgmr.msrb.gmra.mxu1 %v4516_v32  ;;  %2307 = vmatmul.bf16.vlgmr.msrb.gmra.mxu2 %v4516_v32 }
 0x18c   :  { %v2126_v30 = vpop.f32.mrf.mxu0 }
 0x18d   :  { %v2139_v33 = vpop.f32.mrf.mxu1  ;;  %v2127_v35 = vadd.f32 %v2126_v30, %v1433_v29 }
 0x18e   :  { %v2140_v36 = vadd.f32 %v2139_v33, %v1434_v31 }
 0x18f   :  { %v2313_v42 = vmax.f32 %v2127_v35, 0.0 }
 0x190   :  { %v2314_v44 = vmax.f32 %v2140_v36, 0.0 }
 0x191   :  { %v2344_v47 = vrot.slane %v2313_v42, 6 }
 0x192   :  { %v2113_v38 = vpop.f32.mrf.mxu3  ;;  %v2345_v48 = vrot.slane %v2314_v44, 4 }
 0x193   :  { %v2114_v39 = vadd.f32 %v2113_v38, %v1432_v34  ;;  %v2152_v40 = vpop.f32.mrf.mxu2 }
 0x194   :  { %v2153_v45 = vadd.f32 %v2152_v40, %v1435_v37  ;;  %v2128_v55 = vpop.f32.mrf.mxu0 }
 0x195   :  { %v2141_v32 = vpop.f32.mrf.mxu1  ;;  %v2312_v41 = vmax.f32 %v2114_v39, 0.0 }
 0x196   :  { %v2315_v46 = vmax.f32 %v2153_v45, 0.0  ;;  %v1445_v32 = vperm.slane %v1429_v57, 5 }
 0x197   :  { %v2357_v50 = vsel %vm2356_vm1, %v2312_v41, %v2344_v47 }
 0x198   :  { %v2346_v49 = vrot.slane %v2315_v46, 2  ;;  %v1446_v46 = vperm.slane %v1429_v57, 6 }
 0x19a   :  { %v2359_v51 = vsel %vm2358_vm2, %v2345_v48, %v2346_v49  ;;  %v2115_v52 = vpop.f32.mrf.mxu3  ;;  %v1444_v48 = vperm.slane %v1429_v57, 4 }
 0x19b   :  { %v2361_v53 = vsel %vm2360_vm3, %v2357_v50, %v2359_v51  ;;  %v2154_v54 = vpop.f32.mrf.mxu2  ;;  %v1447_v51 = vperm.slane %v1429_v57, 7 }
 0x19c   :  { %2375 = vst [vmem:[%s4931_s5] sm:$0xff] %v2361_v53  ;;  %v2178_v58 = vpop.f32.mrf.mxu0 }
 0x19d   :  { %v2191_v60 = vpop.f32.mrf.mxu1  ;;  %v2179_v43 = vadd.f32 %v2178_v58, %v1437_v56 }
 0x19e   :  { %v2192_v62 = vadd.f32 %v2191_v60, %v1438_v59 }
 0x19f   :  { %v2317_v3 = vmax.f32 %v2179_v43, 0.0 }
 0x1a0   :  { %v2318_v4 = vmax.f32 %v2192_v62, 0.0 }
 0x1a1   :  { %v2347_v11 = vrot.slane %v2317_v3, 6 }
 0x1a2   :  { %v2165_v0 = vpop.f32.mrf.mxu3  ;;  %v2348_v12 = vrot.slane %v2318_v4, 4 }
 0x1a3   :  { %v2166_v1 = vadd.f32 %v2165_v0, %v1436_v61  ;;  %v2204_v2 = vpop.f32.mrf.mxu2 }
 0x1a4   :  { %v2205_v5 = vadd.f32 %v2204_v2, %v1439_v63  ;;  %v2180_v7 = vpop.f32.mrf.mxu0 }
 0x1a5   :  { %v2193_v8 = vpop.f32.mrf.mxu1  ;;  %v2316_v9 = vmax.f32 %v2166_v1, 0.0 }
 0x1a6   :  { %v2319_v10 = vmax.f32 %v2205_v5, 0.0 }
 0x1a7   :  { %v2362_v14 = vsel %vm2356_vm1, %v2316_v9, %v2347_v11 }
 0x1a8   :  { %v2349_v13 = vrot.slane %v2319_v10, 2 }
 0x1aa   :  { %v2363_v15 = vsel %vm2358_vm2, %v2348_v12, %v2349_v13  ;;  %v2167_v16 = vpop.f32.mrf.mxu3 }
 0x1ab   :  { %v2364_v17 = vsel %vm2360_vm3, %v2362_v14, %v2363_v15  ;;  %v2206_v18 = vpop.f32.mrf.mxu2 }
 0x1ac   :  { %2376 = vst [vmem:[%s4931_s5 + $0x8] sm:$0xff] %v2364_v17 }
 0x1ad   :  { %v2230_v21 = vpop.f32.mrf.mxu0 }
 0x1ae   :  { %v2231_v6 = vadd.f32 %v2230_v21, %v1441_v20 }
 0x1b0   :  { %v2243_v23 = vpop.f32.mrf.mxu1  ;;  %v2321_v29 = vmax.f32 %v2231_v6, 0.0 }
 0x1b1   :  { %v2244_v19 = vadd.f32 %v2243_v23, %v1442_v22 }
 0x1b2   :  { %v2350_v37 = vrot.slane %v2321_v29, 6 }
 0x1b3   :  { %v2217_v26 = vpop.f32.mrf.mxu3  ;;  %v2322_v30 = vmax.f32 %v2244_v19, 0.0 }
 0x1b4   :  { %v2218_v27 = vadd.f32 %v2217_v26, %v1440_v25 }
 0x1b5   :  { %v2232_v33 = vpop.f32.mrf.mxu0  ;;  %v2351_v38 = vrot.slane %v2322_v30, 4 }
 0x1b6   :  { %v2256_v28 = vpop.f32.mrf.mxu2  ;;  %v2320_v35 = vmax.f32 %v2218_v27, 0.0 }
 0x1b7   :  { %v2257_v31 = vadd.f32 %v2256_v28, %v1443_v24 }
 0x1b8   :  { %v2245_v34 = vpop.f32.mrf.mxu1  ;;  %v2365_v40 = vsel %vm2356_vm1, %v2320_v35, %v2350_v37 }
 0x1b9   :  { %v2323_v36 = vmax.f32 %v2257_v31, 0.0 }
 0x1bb   :  { %v2352_v39 = vrot.slane %v2323_v36, 2  ;;  %v2219_v44 = vpop.f32.mrf.mxu3 }
 0x1bd   :  { %v2366_v42 = vsel %vm2358_vm2, %v2351_v38, %v2352_v39 }
 0x1be   :  { %v2367_v45 = vsel %vm2360_vm3, %v2365_v40, %v2366_v42  ;;  %v2258_v55 = vpop.f32.mrf.mxu2 }
 0x1bf   :  { %2377 = vst [vmem:[%s4931_s5 + $0x10] sm:$0xff] %v2367_v45 }
 0x1cd   :  { %v2282_v41 = vpop.f32.mrf.mxu0 }
 0x1ce   :  { %v2295_v47 = vpop.f32.mrf.mxu1  ;;  %v2283_v49 = vadd.f32 %v2282_v41, %v1445_v32 }
 0x1cf   :  { %v2296_v50 = vadd.f32 %v2295_v47, %v1446_v46 }
 0x1d0   :  { %v2325_v56 = vmax.f32 %v2283_v49, 0.0 }
 0x1d1   :  { %v2326_v58 = vmax.f32 %v2296_v50, 0.0 }
 0x1d2   :  { %v2353_v63 = vrot.slane %v2325_v56, 6 }
 0x1d3   :  { %v2269_v52 = vpop.f32.mrf.mxu3  ;;  %v2354_v0 = vrot.slane %v2326_v58, 4 }
 0x1d4   :  { %v2270_v53 = vadd.f32 %v2269_v52, %v1444_v48  ;;  %v2308_v54 = vpop.f32.mrf.mxu2 }
 0x1d5   :  { %v2309_v59 = vadd.f32 %v2308_v54, %v1447_v51  ;;  %v2284_v60 = vpop.f32.mrf.mxu0 }
 0x1d6   :  { %v2297_v61 = vpop.f32.mrf.mxu1  ;;  %v2324_v43 = vmax.f32 %v2270_v53, 0.0 }
 0x1d7   :  { %v2327_v62 = vmax.f32 %v2309_v59, 0.0 }
 0x1d8   :  { %v2368_v2 = vsel %vm2356_vm1, %v2324_v43, %v2353_v63 }
 0x1d9   :  { %v2355_v1 = vrot.slane %v2327_v62, 2 }
 0x1db   :  { %v2369_v3 = vsel %vm2358_vm2, %v2354_v0, %v2355_v1  ;;  %v2271_v4 = vpop.f32.mrf.mxu3 }
 0x1dc   :  { %v2370_v5 = vsel %vm2360_vm3, %v2368_v2, %v2369_v3  ;;  %v2310_v7 = vpop.f32.mrf.mxu2 }
 0x1dd   :  { %2383 = vst.msk [vmem:[%s4931_s5 + $0x18] sm:$0xff] %vm2382_vm8, %v2370_v5 }

</bundles_post_ra>
